<compile_context>
chip_gen: v7x
topology: tpu7x:2x2x1
jax: 0.10.0
libtpu: 0.0.40
codegen_flags: <defaults>
</compile_context>

<pallas_src>
import functools

import jax
import jax.numpy as jnp
from jax.experimental import pallas as pl
from jax.experimental.pallas import tpu as pltpu


def _round_up(x, m):
    return ((x + m - 1) // m) * m


def _pad2(x, rows, cols):
    return jnp.pad(x, ((0, rows - x.shape[0]), (0, cols - x.shape[1])))


def _pick_batch_block(B, T_pad, D_pad, itemsize=2, budget_bytes=2 << 20):
    """Largest multiple-of-8 divisor of B whose h block stays under the VMEM budget."""
    if B <= 8 or B % 8 != 0:
        return B  # block dim == full array dim is always legal
    best = 8
    bb = 8
    while bb <= B:
        if B % bb == 0 and bb * T_pad * D_pad * itemsize <= budget_bytes:
            best = bb
        bb += 8
    return best


def _encoder_attention_kernel(*refs, intra_encoder, has_prev):
    if intra_encoder and has_prev:
        (h_ref, st_ref, mask_ref, prev_ref,
         wh_ref, ws_ref, bs_ref, v_ref,
         ct_ref, at_ref, sum_ref) = refs
    elif intra_encoder:
        (h_ref, st_ref, mask_ref,
         wh_ref, ws_ref, bs_ref, v_ref,
         ct_ref, at_ref, sum_ref) = refs
    else:
        (h_ref, st_ref, mask_ref,
         wh_ref, ws_ref, bs_ref, v_ref,
         ct_ref, at_ref) = refs

    h_bf = h_ref[...]          # (BB, Tp, Dp) bf16  encoder states
    mask = mask_ref[...]       # (BB, Tp)     f32   padding mask (0 on pads)
    BB, Tp, Dp = h_bf.shape

    # et = W_h(h): one big MXU matmul, bf16 operands / f32 accumulation.
    et = jnp.dot(h_bf.reshape(BB * Tp, Dp), wh_ref[...],
                 preferred_element_type=jnp.float32)
    # dec_fea = W_s(st_hat) + b  (MXU).
    dec = jnp.dot(st_ref[...], ws_ref[...],
                  preferred_element_type=jnp.float32) + bs_ref[...]
    et = jnp.tanh(et.reshape(BB, Tp, Dp) + dec[:, None, :])          # f32, EUP

    # scores = v(et).squeeze(-1): N=1 projection as VPU multiply + XLU lane reduce.
    scores = jnp.sum(et * v_ref[...].reshape(1, 1, Dp), axis=-1)     # (BB, Tp)

    if intra_encoder:
        # Faithful to the PyTorch branch: no max-subtraction before exp.
        exp_et = jnp.exp(scores)
        if has_prev:
            prev = prev_ref[...]                                     # pads = 1.0
            et1 = exp_et * pl.reciprocal(prev, approx=True)
            sum_ref[...] = prev + exp_et
        else:
            et1 = exp_et
            sum_ref[...] = 1e-10 + exp_et
    else:
        # Plain softmax over the source axis.  Its denominator cancels against the
        # masked renormalization below, so only the stabilizing max-shift matters
        # (and that cancels too) -> exact match with F.softmax + mask + renorm.
        rowmax = jnp.max(scores, axis=1, keepdims=True)
        et1 = jnp.exp(scores - rowmax)

    # at = et1 * mask; at /= at.sum(1)   (pads have mask 0 -> drop out)
    at = et1 * mask
    norm = jnp.sum(at, axis=1, keepdims=True)
    at = at * pl.reciprocal(norm, approx=True)
    at_ref[...] = at

    # ct_e[b] = sum_t at[b, t] * h[b, t, :]   (f32 accumulate; pads contribute 0)
    ct_ref[...] = jnp.sum(at[:, :, None] * h_bf.astype(jnp.float32), axis=1)


def prepare_encoder_attention_params(params, compute_dtype=jnp.bfloat16):
    """One-time prep: transpose to (in, out), pad to multiples of 128, cast MXU operands."""
    D = params["W_h"].shape[0]
    Dp = _round_up(D, 128)
    return {
        "W_h_T": _pad2(params["W_h"].T, Dp, Dp).astype(compute_dtype),
        "W_s_T": _pad2(params["W_s"].T, Dp, Dp).astype(compute_dtype),
        "b_s": _pad2(params["b_s"].reshape(1, D).astype(jnp.float32), 1, Dp),
        "v": _pad2(params["v"].reshape(1, D).astype(jnp.float32), 1, Dp),
        "D": D,
        "D_pad": Dp,
        "compute_dtype": compute_dtype,
    }


def prepare_encoder_states(h, enc_padding_mask, prep):
    """Pad/cast the step-invariant encoder states & mask once per source batch
    (hoists the dominant per-step wrapper HBM traffic out of the decode loop)."""
    B, T, D = h.shape
    assert D == prep["D"]
    Dp, cdt = prep["D_pad"], prep["compute_dtype"]
    Tp = _round_up(T, 128)
    h_p = jnp.pad(h, ((0, 0), (0, Tp - T), (0, Dp - D))).astype(cdt)
    mask_p = jnp.pad(enc_padding_mask.astype(jnp.float32), ((0, 0), (0, Tp - T)))
    return {"h": h_p, "mask": mask_p, "T": T}


def encoder_attention_pallas_prepped(st_hat, enc, sum_temporal_srcs, prep,
                                     intra_encoder=True):
    """Forward pass on pre-padded encoder states (fast path for the decode loop)."""
    h_p, mask_p, T = enc["h"], enc["mask"], enc["T"]
    B, Tp, Dp = h_p.shape
    D, cdt = prep["D"], prep["compute_dtype"]
    st_p = jnp.pad(st_hat, ((0, 0), (0, Dp - D))).astype(cdt)

    has_prev = intra_encoder and (sum_temporal_srcs is not None)

    BB = _pick_batch_block(B, Tp, Dp, itemsize=jnp.dtype(cdt).itemsize)
    grid = (pl.cdiv(B, BB),)

    in_specs = [
        pl.BlockSpec((BB, Tp, Dp), lambda i: (i, 0, 0)),   # h (pipelined)
        pl.BlockSpec((BB, Dp), lambda i: (i, 0)),          # st_hat
        pl.BlockSpec((BB, Tp), lambda i: (i, 0)),          # enc_padding_mask
    ]
    args = [h_p, st_p, mask_p]
    if has_prev:
        # Single stream doubles as the exp() divisor and the running-sum base.
        # Pads use 1.0 so padded lanes never divide by zero; padded columns of the
        # output sum are stripped below, so their values are irrelevant.
        prev_p = jnp.pad(sum_temporal_srcs.astype(jnp.float32),
                         ((0, 0), (0, Tp - T)), constant_values=1.0)
        in_specs.append(pl.BlockSpec((BB, Tp), lambda i: (i, 0)))
        args.append(prev_p)
    in_specs += [
        pl.BlockSpec((Dp, Dp), lambda i: (0, 0)),          # W_h (VMEM-resident)
        pl.BlockSpec((Dp, Dp), lambda i: (0, 0)),          # W_s (VMEM-resident)
        pl.BlockSpec((1, Dp), lambda i: (0, 0)),           # b_s (VMEM-resident)
        pl.BlockSpec((1, Dp), lambda i: (0, 0)),           # v   (VMEM-resident)
    ]
    args += [prep["W_h_T"], prep["W_s_T"], prep["b_s"], prep["v"]]

    out_shape = [
        jax.ShapeDtypeStruct((B, Dp), jnp.float32),        # ct_e
        jax.ShapeDtypeStruct((B, Tp), jnp.float32),        # at
    ]
    out_specs = [
        pl.BlockSpec((BB, Dp), lambda i: (i, 0)),
        pl.BlockSpec((BB, Tp), lambda i: (i, 0)),
    ]
    if intra_encoder:
        out_shape.append(jax.ShapeDtypeStruct((B, Tp), jnp.float32))  # new sum
        out_specs.append(pl.BlockSpec((BB, Tp), lambda i: (i, 0)))

    outs = pl.pallas_call(
        functools.partial(_encoder_attention_kernel,
                          intra_encoder=intra_encoder, has_prev=has_prev),
        out_shape=tuple(out_shape),
        grid=grid,
        in_specs=in_specs,
        out_specs=tuple(out_specs),
        compiler_params=pltpu.CompilerParams(
            dimension_semantics=("parallel",),
            vmem_limit_bytes=48 * 1024 * 1024,
        ),
    )(*args)

    if intra_encoder:
        ct_p, at_p, sum_p = outs
        return ct_p[:, :D], at_p[:, :T], sum_p[:, :T]
    ct_p, at_p = outs
    # PyTorch non-intra branch returns sum_temporal_srcs unchanged.
    return ct_p[:, :D], at_p[:, :T], sum_temporal_srcs


def encoder_attention_pallas(st_hat, h, enc_padding_mask, sum_temporal_srcs, prep,
                             intra_encoder=True):
    """Convenience wrapper: pads the encoder states per call, then runs the kernel."""
    enc = prepare_encoder_states(h, enc_padding_mask, prep)
    return encoder_attention_pallas_prepped(st_hat, enc, sum_temporal_srcs, prep,
                                            intra_encoder=intra_encoder)


def encoder_attention_ref(st_hat, h, enc_padding_mask, sum_temporal_srcs, params,
                          intra_encoder=True):
    """Pure-JAX reference mirroring the PyTorch forward."""
    et = h @ params["W_h"].T
    dec_fea = (st_hat @ params["W_s"].T + params["b_s"])[:, None, :]
    et = jnp.tanh(et + dec_fea)
    et = (et @ params["v"].T)[..., 0]
    if intra_encoder:
        exp_et = jnp.exp(et)
        if sum_temporal_srcs is None:
            et1 = exp_et
            new_sum = 1e-10 + exp_et
        else:
            et1 = exp_et / sum_temporal_srcs
            new_sum = sum_temporal_srcs + exp_et
    else:
        et1 = jax.nn.softmax(et, axis=1)
        new_sum = sum_temporal_srcs
    at = et1 * enc_padding_mask
    at = at / jnp.sum(at, axis=1, keepdims=True)
    ct_e = jnp.einsum("bt,btd->bd", at, h)
    return ct_e, at, new_sum


if __name__ == "__main__":
    hidden_size = 16                # small for the demo (module default is 128)
    D = 2 * hidden_size             # feature dim of encoder states
    B, T = 2, 8                     # batch, source sequence length

    key = jax.random.PRNGKey(0)
    ks = jax.random.split(key, 8)

    # Deterministic parameter init (uniform, PyTorch-Linear-like bounds).
    bound = 1.0 / jnp.sqrt(jnp.float32(D))
    params = {
        "W_h": jax.random.uniform(ks[0], (D, D), jnp.float32, -bound, bound),
        "W_s": jax.random.uniform(ks[1], (D, D), jnp.float32, -bound, bound),
        "b_s": jax.random.uniform(ks[2], (D,), jnp.float32, -bound, bound),
        "v":   jax.random.uniform(ks[3], (1, D), jnp.float32, -bound, bound),
    }

    # Inputs
    st_hat = jax.random.normal(ks[4], (B, D), jnp.float32)
    h = jax.random.normal(ks[5], (B, T, D), jnp.float32)
    enc_padding_mask = jnp.concatenate(
        [jnp.ones((B, T - 2), jnp.float32), jnp.zeros((B, 2), jnp.float32)], axis=1)
    sum_temporal_srcs = jax.random.uniform(
        ks[6], (B, T), jnp.float32, 0.5, 2.0)   # previous decoder-step sums

    # One-time prep (weights + encoder states) hoisted out of the decode loop.
    prep = prepare_encoder_attention_params(params)
    enc = prepare_encoder_states(h, enc_padding_mask, prep)

    # 1) intra-temporal attention with a previous temporal sum.
    ct_e, at, new_sum = encoder_attention_pallas_prepped(
        st_hat, enc, sum_temporal_srcs, prep)
    jax.block_until_ready((ct_e, at, new_sum))

    # 2) intra-temporal attention, first decoder step (sum_temporal_srcs=None).
    ct0, at0, sum0 = encoder_attention_pallas_prepped(st_hat, enc, None, prep)
    jax.block_until_ready((ct0, at0, sum0))

    # 3) plain-softmax branch (intra_encoder=False).
    ct_s, at_s, sum_s = encoder_attention_pallas(
        st_hat, h, enc_padding_mask, sum_temporal_srcs, prep, intra_encoder=False)
    jax.block_until_ready((ct_s, at_s))

    # Correctness vs pure-JAX f32 reference.  Tolerance covers bf16 MXU operands
    # + EUP approximate reciprocals.
    RTOL = ATOL = 1e-2
    r_ct, r_at, r_sum = encoder_attention_ref(
        st_hat, h, enc_padding_mask, sum_temporal_srcs, params)
    assert jnp.allclose(ct_e, r_ct, rtol=RTOL, atol=ATOL)
    assert jnp.allclose(at, r_at, rtol=RTOL, atol=ATOL)
    assert jnp.allclose(new_sum, r_sum, rtol=RTOL, atol=ATOL)

    r_ct0, r_at0, r_sum0 = encoder_attention_ref(
        st_hat, h, enc_padding_mask, None, params)
    assert jnp.allclose(ct0, r_ct0, rtol=RTOL, atol=ATOL)
    assert jnp.allclose(at0, r_at0, rtol=RTOL, atol=ATOL)
    assert jnp.allclose(sum0, r_sum0, rtol=RTOL, atol=ATOL)

    r_cts, r_ats, _ = encoder_attention_ref(
        st_hat, h, enc_padding_mask, sum_temporal_srcs, params, intra_encoder=False)
    assert jnp.allclose(ct_s, r_cts, rtol=RTOL, atol=ATOL)
    assert jnp.allclose(at_s, r_ats, rtol=RTOL, atol=ATOL)
    assert sum_s is sum_temporal_srcs   # non-intra branch passes the sum through

    print("KERNEL_OK")
</pallas_src>

<mosaic_0001>
module attributes {stable_mosaic.version = 11 : i64} {
  func.func @_encoder_attention_kernel(%arg0: i32, %arg1: memref<2x128x128xbf16, #tpu.memory_space<vmem>>, %arg2: memref<2x128xbf16, #tpu.memory_space<vmem>>, %arg3: memref<2x128xf32, #tpu.memory_space<vmem>>, %arg4: memref<2x128xf32, #tpu.memory_space<vmem>>, %arg5: memref<128x128xbf16, #tpu.memory_space<vmem>>, %arg6: memref<128x128xbf16, #tpu.memory_space<vmem>>, %arg7: memref<1x128xf32, #tpu.memory_space<vmem>>, %arg8: memref<1x128xf32, #tpu.memory_space<vmem>>, %arg9: memref<2x128xf32, #tpu.memory_space<vmem>>, %arg10: memref<2x128xf32, #tpu.memory_space<vmem>>, %arg11: memref<2x128xf32, #tpu.memory_space<vmem>>) attributes {dimension_semantics = [#tpu.dimension_semantics<parallel>], iteration_bounds = array<i64: 1>, scalar_prefetch = 0 : i64, scratch_operands = 0 : i64, tpu.core_type = #tpu.core_type<tc>, window_params = [{transform_indices = @transform_0, window_bounds = array<i64: 2, 128, 128>}, {transform_indices = @transform_1, window_bounds = array<i64: 2, 128>}, {transform_indices = @transform_2, window_bounds = array<i64: 2, 128>}, {transform_indices = @transform_3, window_bounds = array<i64: 2, 128>}, {pipeline_mode = #tpu.pipeline_mode<synchronous>, transform_indices = @transform_4, window_bounds = array<i64: 128, 128>}, {pipeline_mode = #tpu.pipeline_mode<synchronous>, transform_indices = @transform_5, window_bounds = array<i64: 128, 128>}, {pipeline_mode = #tpu.pipeline_mode<synchronous>, transform_indices = @transform_6, window_bounds = array<i64: 1, 128>}, {pipeline_mode = #tpu.pipeline_mode<synchronous>, transform_indices = @transform_7, window_bounds = array<i64: 1, 128>}, {transform_indices = @transform_8, window_bounds = array<i64: 2, 128>}, {transform_indices = @transform_9, window_bounds = array<i64: 2, 128>}, {transform_indices = @transform_10, window_bounds = array<i64: 2, 128>}]} {
    %c0 = arith.constant 0 : index
    %c0_0 = arith.constant 0 : index
    %c0_1 = arith.constant 0 : index
    %0 = vector.load %arg1[%c0, %c0_0, %c0_1] : memref<2x128x128xbf16, #tpu.memory_space<vmem>>, vector<2x128x128xbf16>
    %c0_2 = arith.constant 0 : index
    %c0_3 = arith.constant 0 : index
    %1 = vector.load %arg3[%c0_2, %c0_3] : memref<2x128xf32, #tpu.memory_space<vmem>>, vector<2x128xf32>
    %2 = vector.shape_cast %0 : vector<2x128x128xbf16> to vector<256x128xbf16>
    %c0_4 = arith.constant 0 : index
    %c0_5 = arith.constant 0 : index
    %3 = vector.load %arg5[%c0_4, %c0_5] : memref<128x128xbf16, #tpu.memory_space<vmem>>, vector<128x128xbf16>
    %cst = arith.constant dense<0.000000e+00> : vector<256x128xf32>
    %4 = tpu.matmul %2, %3, %cst {dimension_numbers = #tpu.dot_dimension_numbers<[1], [0], [0], [1], [0, 0, 1, 1], [], []>} : vector<256x128xbf16>, vector<128x128xbf16>, vector<256x128xf32> -> vector<256x128xf32>
    %c0_6 = arith.constant 0 : index
    %c0_7 = arith.constant 0 : index
    %5 = vector.load %arg2[%c0_6, %c0_7] : memref<2x128xbf16, #tpu.memory_space<vmem>>, vector<2x128xbf16>
    %c0_8 = arith.constant 0 : index
    %c0_9 = arith.constant 0 : index
    %6 = vector.load %arg6[%c0_8, %c0_9] : memref<128x128xbf16, #tpu.memory_space<vmem>>, vector<128x128xbf16>
    %cst_10 = arith.constant dense<0.000000e+00> : vector<2x128xf32>
    %7 = tpu.matmul %5, %6, %cst_10 {dimension_numbers = #tpu.dot_dimension_numbers<[1], [0], [0], [1], [0, 0, 1, 1], [], []>} : vector<2x128xbf16>, vector<128x128xbf16>, vector<2x128xf32> -> vector<2x128xf32>
    %c0_11 = arith.constant 0 : index
    %c0_12 = arith.constant 0 : index
    %8 = vector.load %arg7[%c0_11, %c0_12] : memref<1x128xf32, #tpu.memory_space<vmem>>, vector<1x128xf32>
    %9 = vector.broadcast %8 : vector<1x128xf32> to vector<2x128xf32>
    %10 = arith.addf %7, %9 : vector<2x128xf32>
    %11 = vector.shape_cast %4 : vector<256x128xf32> to vector<2x128x128xf32>
    %12 = vector.shape_cast %10 : vector<2x128xf32> to vector<2x1x128xf32>
    %13 = vector.broadcast %12 : vector<2x1x128xf32> to vector<2x128x128xf32>
    %14 = arith.addf %11, %13 : vector<2x128x128xf32>
    %15 = math.tanh %14 : vector<2x128x128xf32>
    %c0_13 = arith.constant 0 : index
    %c0_14 = arith.constant 0 : index
    %16 = vector.load %arg8[%c0_13, %c0_14] : memref<1x128xf32, #tpu.memory_space<vmem>>, vector<1x128xf32>
    %17 = vector.shape_cast %16 : vector<1x128xf32> to vector<1x1x128xf32>
    %18 = vector.broadcast %17 : vector<1x1x128xf32> to vector<2x128x128xf32>
    %19 = arith.mulf %15, %18 : vector<2x128x128xf32>
    %cst_15 = arith.constant dense<0.000000e+00> : vector<2x128xf32>
    %20 = vector.multi_reduction <add>, %19, %cst_15 [2] : vector<2x128x128xf32> to vector<2x128xf32>
    %21 = math.exp %20 : vector<2x128xf32>
    %c0_16 = arith.constant 0 : index
    %c0_17 = arith.constant 0 : index
    %22 = vector.load %arg4[%c0_16, %c0_17] : memref<2x128xf32, #tpu.memory_space<vmem>>, vector<2x128xf32>
    %23 = tpu.reciprocal %22 {approx = true} : vector<2x128xf32> -> vector<2x128xf32>
    %24 = arith.mulf %21, %23 : vector<2x128xf32>
    %25 = arith.addf %22, %21 : vector<2x128xf32>
    %c0_18 = arith.constant 0 : index
    %c0_19 = arith.constant 0 : index
    %26 = vector.load %arg11[%c0_18, %c0_19] : memref<2x128xf32, #tpu.memory_space<vmem>>, vector<2x128xf32>
    tpu.vector_store %arg11[%c0_18, %c0_19], %25 {strides = array<i32>} : memref<2x128xf32, #tpu.memory_space<vmem>>, vector<2x128xf32>,
    %27 = arith.mulf %24, %1 : vector<2x128xf32>
    %cst_20 = arith.constant dense<0.000000e+00> : vector<2xf32>
    %28 = vector.multi_reduction <add>, %27, %cst_20 [1] : vector<2x128xf32> to vector<2xf32>
    %29 = vector.shape_cast %28 : vector<2xf32> to vector<2x1xf32>
    %30 = tpu.reciprocal %29 {approx = true} : vector<2x1xf32> -> vector<2x1xf32>
    %31 = vector.broadcast %30 : vector<2x1xf32> to vector<2x128xf32>
    %32 = arith.mulf %27, %31 : vector<2x128xf32>
    %c0_21 = arith.constant 0 : index
    %c0_22 = arith.constant 0 : index
    %33 = vector.load %arg10[%c0_21, %c0_22] : memref<2x128xf32, #tpu.memory_space<vmem>>, vector<2x128xf32>
    tpu.vector_store %arg10[%c0_21, %c0_22], %32 {strides = array<i32>} : memref<2x128xf32, #tpu.memory_space<vmem>>, vector<2x128xf32>,
    %34 = vector.shape_cast %32 : vector<2x128xf32> to vector<2x128x1xf32>
    %35 = arith.extf %0 : vector<2x128x128xbf16> to vector<2x128x128xf32>
    %36 = vector.broadcast %34 : vector<2x128x1xf32> to vector<2x128x128xf32>
    %37 = arith.mulf %36, %35 : vector<2x128x128xf32>
    %cst_23 = arith.constant dense<0.000000e+00> : vector<2x128xf32>
    %38 = vector.multi_reduction <add>, %37, %cst_23 [1] : vector<2x128x128xf32> to vector<2x128xf32>
    %c0_24 = arith.constant 0 : index
    %c0_25 = arith.constant 0 : index
    %39 = vector.load %arg9[%c0_24, %c0_25] : memref<2x128xf32, #tpu.memory_space<vmem>>, vector<2x128xf32>
    tpu.vector_store %arg9[%c0_24, %c0_25], %38 {strides = array<i32>} : memref<2x128xf32, #tpu.memory_space<vmem>>, vector<2x128xf32>,
    return
  }
  func.func @transform_0(%arg0: i32) -> (i32, i32, i32) {
    %c0_i32 = arith.constant 0 : i32
    %c0_i32_0 = arith.constant 0 : i32
    %c0_i32_1 = arith.constant 0 : i32
    return %arg0, %c0_i32, %c0_i32_0 : i32, i32, i32
  }
  func.func @transform_1(%arg0: i32) -> (i32, i32) {
    %c0_i32 = arith.constant 0 : i32
    %c0_i32_0 = arith.constant 0 : i32
    return %arg0, %c0_i32 : i32, i32
  }
  func.func @transform_2(%arg0: i32) -> (i32, i32) {
    %c0_i32 = arith.constant 0 : i32
    %c0_i32_0 = arith.constant 0 : i32
    return %arg0, %c0_i32 : i32, i32
  }
  func.func @transform_3(%arg0: i32) -> (i32, i32) {
    %c0_i32 = arith.constant 0 : i32
    %c0_i32_0 = arith.constant 0 : i32
    return %arg0, %c0_i32 : i32, i32
  }
  func.func @transform_4(%arg0: i32) -> (i32, i32) {
    %c0_i32 = arith.constant 0 : i32
    %c0_i32_0 = arith.constant 0 : i32
    %c0_i32_1 = arith.constant 0 : i32
    return %c0_i32, %c0_i32_0 : i32, i32
  }
  func.func @transform_5(%arg0: i32) -> (i32, i32) {
    %c0_i32 = arith.constant 0 : i32
    %c0_i32_0 = arith.constant 0 : i32
    %c0_i32_1 = arith.constant 0 : i32
    return %c0_i32, %c0_i32_0 : i32, i32
  }
  func.func @transform_6(%arg0: i32) -> (i32, i32) {
    %c0_i32 = arith.constant 0 : i32
    %c0_i32_0 = arith.constant 0 : i32
    %c0_i32_1 = arith.constant 0 : i32
    return %c0_i32, %c0_i32_0 : i32, i32
  }
  func.func @transform_7(%arg0: i32) -> (i32, i32) {
    %c0_i32 = arith.constant 0 : i32
    %c0_i32_0 = arith.constant 0 : i32
    %c0_i32_1 = arith.constant 0 : i32
    return %c0_i32, %c0_i32_0 : i32, i32
  }
  func.func @transform_8(%arg0: i32) -> (i32, i32) {
    %c0_i32 = arith.constant 0 : i32
    %c0_i32_0 = arith.constant 0 : i32
    return %arg0, %c0_i32 : i32, i32
  }
  func.func @transform_9(%arg0: i32) -> (i32, i32) {
    %c0_i32 = arith.constant 0 : i32
    %c0_i32_0 = arith.constant 0 : i32
    return %arg0, %c0_i32 : i32, i32
  }
  func.func @transform_10(%arg0: i32) -> (i32, i32) {
    %c0_i32 = arith.constant 0 : i32
    %c0_i32_0 = arith.constant 0 : i32
    return %arg0, %c0_i32 : i32, i32
  }
}

</mosaic_0001>

<bundles_post_ra>
// kernel: tpu_custom_call.1
= control target key start
LH: loop header
LB: loop body
LE: loop exit
PB: predicated region body
PF: predicated region fallthrough
CT: control target
= control target key end

     0   :  { %16 = vsyncpa [#allocation3], 0  ;;  %s3755_s0 = inlined_call_operand.hbm [shape: bf16[2,128,128], index: 0, kind: input, shape index: {}]   ;;  %s3756_s1 = inlined_call_operand.vmem [shape: bf16[2,128], index: 1, kind: input, shape index: {}]   ;;  %s3757_s2 = inlined_call_operand.vmem [shape: f32[2,128], index: 2, kind: input, shape index: {}]   ;;  %s3758_s3 = inlined_call_operand.vmem [shape: f32[2,128], index: 3, kind: input, shape index: {}]   ;;  %s3759_s4 = inlined_call_operand.hbm [shape: bf16[128,128], index: 4, kind: input, shape index: {}]   ;;  %s3760_s5 = inlined_call_operand.hbm [shape: bf16[128,128], index: 5, kind: input, shape index: {}]   ;;  %s3761_s6 = inlined_call_operand.vmem [shape: f32[1,128], index: 6, kind: input, shape index: {}]   ;;  %s3762_s7 = inlined_call_operand.vmem [shape: f32[1,128], index: 7, kind: input, shape index: {}]   ;;  %s3763_s8 = inlined_call_operand.hbm [shape: f32[2,128], index: 8, kind: output, shape index: {0}]   ;;  %s3764_s9 = inlined_call_operand.hbm [shape: f32[2,128], index: 9, kind: output, shape index: {1}]   ;;  %s3765_s10 = inlined_call_operand.hbm [shape: f32[2,128], index: 10, kind: output, shape index: {2}]  }
   0x1   :  { %17 = vsyncpa [#allocation6], 0 }
   0x2   :  { %18 = vsyncpa [#allocation4], 0 }
   0x3   :  { %19 = vsyncpa [#allocation10], 0  ;;  %s2730_s13 = smov [#allocation5]   ;;  %s2731_s15 = smov [#allocation2]  }
   0x4   :  { %s43_s14 = sshll.u32 %s2730_s13, 4  ;;  %s25_s16 = sshll.u32 %s2731_s15, 4  ;;  %s44_s14 = int_to_ptr.vmem [resolvable:$true] %s43_s14  ;;  %s2797_s16 = int_to_ptr.vmem [resolvable:$true] %s25_s16 }
   0x5   :  { %s2590_s19 = scalar_lea.hbm %s3759_s4, 1024 }
   0x6   :  { %p2591_p0 = scmp.ne.s32.totalorder %s3759_s4, %s2590_s19  ;;  %p2594_p1 = scmp.lt.u32.totalorder %s2590_s19, %s3759_s4 }
   0x8   :  { %p2596_p2 = pnand %p2594_p1, %p2591_p0 }
   0xa   :  { %2599 = shalt.err (!%p2596_p2)
}
   0xb   :  { %s2600_s24 = scalar_lea.vmem %s44_s14, 1024  ;;  %p2605_p4 = scmp.lt.s32.totalorder %s44_s14, %s44_s14 }
   0xc   :  { %p2601_p3 = scmp.ne.s32.totalorder %s44_s14, %s2600_s24  ;;  %p2606_p5 = scmp.lt.s32.totalorder %s2600_s24, %s2600_s24 }
   0xe   :  { %p2607_p6 = por %p2606_p5, %p2605_p4 }
  0x10   :  { %p2608_p7 = pnand %p2607_p6, %p2601_p3 }
  0x12   :  { %2611 = shalt.err (!%p2608_p7)
}
  0x13   :  { %s2732_s25 = smov 64   ;;  %s2733_s26 = smov 4  }
  0x14   :  { %49 = dma.hbm_to_vmem [thread:$0]  %s3759_s4, 1024, %s44_s14, [#allocation6], %s2732_s25, %s2732_s25, %s2733_s26  }
  0x15   :  { %s2612_s11 = scalar_lea.hbm %s3755_s0, 2048 }
  0x16   :  { %p2613_p8 = scmp.ne.s32.totalorder %s3755_s0, %s2612_s11  ;;  %p2616_p9 = scmp.lt.u32.totalorder %s2612_s11, %s3755_s0 }
  0x18   :  { %p2618_p10 = pnand %p2616_p9, %p2613_p8 }
  0x1a   :  { %2621 = shalt.err (!%p2618_p10)
}
  0x1b   :  { %s2622_s18 = scalar_lea.vmem %s2797_s16, 2048  ;;  %p2627_p12 = scmp.lt.s32.totalorder %s2797_s16, %s2797_s16 }
  0x1c   :  { %p2623_p11 = scmp.ne.s32.totalorder %s2797_s16, %s2622_s18  ;;  %p2628_p13 = scmp.lt.s32.totalorder %s2622_s18, %s2622_s18 }
  0x1e   :  { %p2629_p0 = por %p2628_p13, %p2627_p12 }
  0x20   :  { %p2630_p1 = pnand %p2629_p0, %p2623_p11 }
  0x22   :  { %2633 = shalt.err (!%p2630_p1)
}
  0x23   :  { %31 = dma.hbm_to_vmem [thread:$0]  %s3755_s0, 2048, %s2797_s16, [#allocation3], %s2732_s25, %s2732_s25, %s2733_s26  }
  0x24   :  { %s2734_s19 = smov [#allocation7]   ;;  %s2634_s23 = scalar_lea.hbm %s3760_s5, 1024 }
  0x25   :  { %s55_s20 = sshll.u32 %s2734_s19, 4  ;;  %p2635_p2 = scmp.ne.s32.totalorder %s3760_s5, %s2634_s23  ;;  %s56_s20 = int_to_ptr.vmem [resolvable:$true] %s55_s20 }
  0x26   :  { %p2638_p3 = scmp.lt.u32.totalorder %s2634_s23, %s3760_s5 }
  0x28   :  { %p2640_p4 = pnand %p2638_p3, %p2635_p2 }
  0x2a   :  { %2643 = shalt.err (!%p2640_p4)
}
  0x2b   :  { %s2644_s30 = scalar_lea.vmem %s56_s20, 1024  ;;  %p2649_p6 = scmp.lt.s32.totalorder %s56_s20, %s56_s20 }
  0x2c   :  { %p2645_p5 = scmp.ne.s32.totalorder %s56_s20, %s2644_s30  ;;  %p2650_p7 = scmp.lt.s32.totalorder %s2644_s30, %s2644_s30 }
  0x2e   :  { %p2651_p8 = por %p2650_p7, %p2649_p6 }
  0x30   :  { %p2652_p9 = pnand %p2651_p8, %p2645_p5 }
  0x32   :  { %2655 = shalt.err (!%p2652_p9)
}
  0x33   :  { %61 = dma.hbm_to_vmem [thread:$0]  %s3760_s5, 1024, %s56_s20, [#allocation6], %s2732_s25, %s2732_s25, %s2733_s26  }
  0x34   :  { %2722 = dma.done.wait [#allocation3], 2048  }
  0x35   :  { %2723 = vsyncadd [#allocation3], 4294965248 }
  0x36   :  { %2724 = dma.done.wait [#allocation6], 2048  }
  0x37   :  { %2725 = vsyncadd [#allocation6], 4294965248  ;;  %v2735_v0 = vmov 0.0   ;;  %vm2736_vm0 = vmmov 0   ;;  %v2393_v1 = vld [vmem:[#allocation5] sm:$0xff]   ;;  %v2395_v3 = vld [vmem:[#allocation5 + $0x8] sm:$0xff]   ;;  %v3766_v15 = vlaneseq }
  0x38   :  { %2359 = vmatprep.subr.bf16.mxu1 %v2735_v0  ;;  %2375 = vmatprep.mubr.msk.bf16.mxu1 %vm2736_vm0, %v2735_v0  ;;  %v2394_v2 = vld [vmem:[#allocation7] sm:$0xff]   ;;  %v2396_v4 = vld [vmem:[#allocation7 + $0x8] sm:$0xff]   ;;  %v2397_v5 = vld [vmem:[#allocation5 + $0x10] sm:$0xff]   ;;  %v2737_v49 = vmov 1966171168   ;;  %vm1050_vm1 = vcmask 130112  }
  0x39   :  { %2311 = vmatprep.subr.bf16.mxu0 %v2393_v1  ;;  %2360 = vmatpush3.bf16.msra.mxu1 %v2394_v2  ;;  %v2398_v6 = vld [vmem:[#allocation7 + $0x10] sm:$0xff]   ;;  %v2399_v7 = vld [vmem:[#allocation5 + $0x18] sm:$0xff]   ;;  %v2401_v9 = vld [vmem:[#allocation5 + $0x20] sm:$0xff]   ;;  %v2853_v19 = vshrl.u32 %v3766_v15, 7  ;;  %v544_v50 = vunpack.c.l.s4 %v2737_v49  ;;  %vm1057_vm2 = vcmask 195712   ;;  %vm1064_vm3 = vcmask 261312  }
  0x3a   :  { %2312 = vmatpush3.bf16.msra.mxu0 %v2393_v1  ;;  %2361 = vmatprep.subr.bf16.mxu1 %v2735_v0  ;;  %v2400_v8 = vld [vmem:[#allocation7 + $0x18] sm:$0xff]   ;;  %v2402_v10 = vld [vmem:[#allocation7 + $0x20] sm:$0xff]   ;;  %v2403_v11 = vld [vmem:[#allocation5 + $0x28] sm:$0xff]   ;;  %vm1071_vm4 = vcmask 326912   ;;  %vm1078_vm5 = vcmask 392512   ;;  %vm1085_vm6 = vcmask 458112  }
  0x3b   :  { %2313 = vmatprep.subr.bf16.mxu0 %v2395_v3  ;;  %v76_v12 = vld [vmem:[#allocation2] sm:$0xff]   ;;  %v2404_v13 = vld [vmem:[#allocation7 + $0x28] sm:$0xff]   ;;  %v2405_v14 = vld [vmem:[#allocation5 + $0x30] sm:$0xff]   ;;  %v2856_v23 = vsub.s32 0, %v2853_v19  ;;  %v2863_v33 = vsub.s32 1, %v2853_v19  ;;  %v545_v53 = vunpack.c.0.s8 %v544_v50  ;;  %vm1092_vm7 = vcmask 523712  }
  0x3c   :  { %2327 = vmatprep.mubr.bf16.mxu0 %v76_v12  ;;  %v806_v16 = vld [vmem:[%s3758_s3] sm:$0x3]  ;;  %v2406_v17 = vld [vmem:[#allocation7 + $0x30] sm:$0xff]   ;;  %v2407_v18 = vld [vmem:[#allocation5 + $0x38] sm:$0xff]   ;;  %vm1099_vm8 = vcmask 589312   ;;  %vm1106_vm9 = vcmask 654912  }
  0x3d   :  { %2362 = vmatpush3.bf16.msra.mxu1 %v2396_v4  ;;  %2441 = vrcp.f32 %v806_v16  ;;  %v2408_v20 = vld [vmem:[#allocation7 + $0x38] sm:$0xff]   ;;  %v78_v21 = vld [vmem:[#allocation2 + $0x8] sm:$0xff]   ;;  %v80_v22 = vld [vmem:[#allocation2 + $0x10] sm:$0xff]   ;;  %3787 = vst [vmem:[#allocation16_spill] sm:$0xff] %v2856_v23  ;;  %v2923_v56 = vsub.s32 %v545_v53, %v2853_v19  ;;  %vm3786_vm10 = vcmask 720512   ;;  %vm1120_vm11 = vcmask 786112  }
  0x3e   :  { %2314 = vmatpush3.bf16.msra.mxu0 %v2395_v3  ;;  %2363 = vmatprep.subr.bf16.mxu1 %v2735_v0  ;;  %v430_v24 = vld [vmem:[%s3756_s1] sm:$0x1]  ;;  %v82_v27 = vld [vmem:[#allocation2 + $0x18] sm:$0xff]   ;;  %v86_v29 = vld [vmem:[#allocation2 + $0x28] sm:$0xff]   ;;  %3788 = vst [vmem:[#allocation17_spill] sm:$0xff] %v2863_v33  ;;  %vm1127_vm12 = vcmask 851712  }
  0x3f   :  { %2315 = vmatprep.subr.bf16.mxu0 %v2397_v5  ;;  %v84_v28 = vld [vmem:[#allocation2 + $0x20] sm:$0xff]   ;;  %v88_v30 = vld [vmem:[#allocation2 + $0x30] sm:$0xff]   ;;  %v90_v31 = vld [vmem:[#allocation2 + $0x38] sm:$0xff]   ;;  %vm1134_vm13 = vcmask 917312   ;;  %vm1141_vm14 = vcmask 982912   ;;  %vm1148_vm15 = vcmask 1048512  }
  0x40   :  { %v92_v32 = vld [vmem:[#allocation2 + $0x40] sm:$0xff]   ;;  %v94_v34 = vld [vmem:[#allocation2 + $0x48] sm:$0xff]   ;;  %v96_v35 = vld [vmem:[#allocation2 + $0x50] sm:$0xff]   ;;  %vm1229_vm0 = vcmask 1041409   ;;  %s2740_s4 = smov [#allocation11]  }
  0x41   :  { %2364 = vmatpush3.bf16.msra.mxu1 %v2398_v6  ;;  %v98_v37 = vld [vmem:[#allocation2 + $0x58] sm:$0xff]   ;;  %v100_v38 = vld [vmem:[#allocation2 + $0x60] sm:$0xff]   ;;  %v102_v39 = vld [vmem:[#allocation2 + $0x68] sm:$0xff]   ;;  %s2227_s14 = sshll.u32 %s2740_s4, 4  ;;  %s3711_s14 = int_to_ptr.vmem [resolvable:$true] %s2227_s14 }
  0x42   :  { %2316 = vmatpush3.bf16.msra.mxu0 %v2397_v5  ;;  %2365 = vmatprep.subr.bf16.mxu1 %v2735_v0  ;;  %v104_v40 = vld [vmem:[#allocation2 + $0x70] sm:$0xff]   ;;  %v106_v41 = vld [vmem:[#allocation2 + $0x78] sm:$0xff]   ;;  %v108_v42 = vld [vmem:[%s3757_s2] sm:$0x3] }
  0x43   :  { %2317 = vmatprep.subr.bf16.mxu0 %v2399_v7  ;;  %v2870_v43 = vrot.slane %v108_v42, %v2856_v23  ;;  %v2877_v44 = vrot.slane %v108_v42, %v2863_v33  ;;  %v2268_v54 = vld [vmem:[%s3761_s6] ss:$0 sm:$0xff] }
  0x45   :  { %2366 = vmatpush3.bf16.msra.mxu1 %v2400_v8 }
  0x46   :  { %2318 = vmatpush3.bf16.msra.mxu0 %v2399_v7  ;;  %2367 = vmatprep.subr.bf16.mxu1 %v2735_v0 }
  0x47   :  { %2319 = vmatprep.subr.bf16.mxu0 %v2401_v9  ;;  %v2442_v25 = vpop.eup %2441 }
  0x48   :  { %v812_v26 = vrot.slane %v2442_v25, %v2856_v23  ;;  %v879_v36 = vrot.slane %v2442_v25, %v2863_v33 }
  0x49   :  { %2368 = vmatpush3.bf16.msra.mxu1 %v2402_v10 }
  0x4a   :  { %2320 = vmatpush3.bf16.msra.mxu0 %v2401_v9  ;;  %2369 = vmatprep.subr.bf16.mxu1 %v2735_v0 }
  0x4b   :  { %2321 = vmatprep.subr.bf16.mxu0 %v2403_v11  ;;  %818 = vbcast.lane.b32.xlu1 %v812_v26, 264 }
  0x4c   :  { %814 = vbcast.lane.b32.xlu0 %v812_v26, 256 }
  0x4d   :  { %2370 = vmatpush3.bf16.msra.mxu1 %v2404_v13 }
  0x4e   :  { %2322 = vmatpush3.bf16.msra.mxu0 %v2403_v11  ;;  %2371 = vmatprep.subr.bf16.mxu1 %v2735_v0 }
  0x4f   :  { %2323 = vmatprep.subr.bf16.mxu0 %v2405_v14  ;;  %822 = vbcast.lane.b32.xlu1 %v812_v26, 272 }
  0x50   :  { %830 = vbcast.lane.b32.xlu0 %v812_v26, 288 }
  0x51   :  { %2372 = vmatpush3.bf16.msra.mxu1 %v2406_v17 }
  0x52   :  { %2324 = vmatpush3.bf16.msra.mxu0 %v2405_v14  ;;  %2373 = vmatprep.subr.bf16.mxu1 %v2735_v0 }
  0x53   :  { %2325 = vmatprep.subr.bf16.mxu0 %v2407_v18  ;;  %826 = vbcast.lane.b32.xlu1 %v812_v26, 280 }
  0x54   :  { %838 = vbcast.lane.b32.xlu0 %v812_v26, 304 }
  0x55   :  { %2374 = vmatpush3.bf16.msra.mxu1 %v2408_v20 }
  0x56   :  { %2326 = vmatpush3.bf16.msra.mxu0 %v2407_v18 }
  0x57   :  { %834 = vbcast.lane.b32.xlu1 %v812_v26, 296 }
  0x58   :  { %2376 = vmatmul.mubr.bf16.vlgmr.msra.gmra.mrb[0].mxu1 %v430_v24  ;;  %846 = vbcast.lane.b32.xlu0 %v812_v26, 320 }
  0x59   :  { %2328 = vmatmul.mubr.bf16.vlgmr.msra.gmra.mrb[0].mxu0 %v78_v21 }
  0x5a   :  { %2331 = vmatprep.mubr.bf16.mxu0 %v80_v22 }
  0x5b   :  { %842 = vbcast.lane.b32.xlu1 %v812_v26, 312 }
  0x5c   :  { %854 = vbcast.lane.b32.xlu0 %v812_v26, 336 }
  0x5f   :  { %850 = vbcast.lane.b32.xlu1 %v812_v26, 328 }
  0x60   :  { %862 = vbcast.lane.b32.xlu0 %v812_v26, 352 }
  0x61   :  { %2332 = vmatmul.mubr.bf16.gmra.mrb[4].mxu0 %v82_v27 }
  0x62   :  { %2335 = vmatprep.mubr.bf16.mxu0 %v84_v28 }
  0x63   :  { %858 = vbcast.lane.b32.xlu1 %v812_v26, 344 }
  0x64   :  { %870 = vbcast.lane.b32.xlu0 %v812_v26, 368 }
  0x67   :  { %866 = vbcast.lane.b32.xlu1 %v812_v26, 360 }
  0x68   :  { %881 = vbcast.lane.b32.xlu0 %v879_v36, 256 }
  0x69   :  { %2336 = vmatmul.mubr.bf16.gmra.mrb[8].mxu0 %v86_v29 }
  0x6a   :  { %2339 = vmatprep.mubr.bf16.mxu0 %v88_v30 }
  0x6b   :  { %874 = vbcast.lane.b32.xlu1 %v812_v26, 376 }
  0x6c   :  { %889 = vbcast.lane.b32.xlu0 %v879_v36, 272 }
  0x6f   :  { %885 = vbcast.lane.b32.xlu1 %v879_v36, 264 }
  0x70   :  { %897 = vbcast.lane.b32.xlu0 %v879_v36, 288 }
  0x71   :  { %2340 = vmatmul.mubr.bf16.gmra.mrb[12].mxu0 %v90_v31 }
  0x72   :  { %2343 = vmatprep.mubr.bf16.mxu0 %v92_v32 }
  0x73   :  { %893 = vbcast.lane.b32.xlu1 %v879_v36, 280 }
  0x74   :  { %905 = vbcast.lane.b32.xlu0 %v879_v36, 304 }
  0x77   :  { %901 = vbcast.lane.b32.xlu1 %v879_v36, 296 }
  0x78   :  { %913 = vbcast.lane.b32.xlu0 %v879_v36, 320 }
  0x79   :  { %2344 = vmatmul.mubr.bf16.gmra.mrb[16].mxu0 %v94_v34 }
  0x7a   :  { %2347 = vmatprep.mubr.bf16.mxu0 %v96_v35  ;;  %v2945_v35 = vld [vmem:[%s3762_s7] ss:$0 sm:$0xff] }
  0x7b   :  { %909 = vbcast.lane.b32.xlu1 %v879_v36, 312 }
  0x7c   :  { %921 = vbcast.lane.b32.xlu0 %v879_v36, 336 }
  0x7f   :  { %917 = vbcast.lane.b32.xlu1 %v879_v36, 328 }
  0x80   :  { %929 = vbcast.lane.b32.xlu0 %v879_v36, 352 }
  0x81   :  { %2348 = vmatmul.mubr.bf16.gmra.mrb[20].mxu0 %v98_v37 }
  0x82   :  { %2351 = vmatprep.mubr.bf16.mxu0 %v100_v38 }
  0x83   :  { %925 = vbcast.lane.b32.xlu1 %v879_v36, 344 }
  0x84   :  { %937 = vbcast.lane.b32.xlu0 %v879_v36, 368 }
  0x87   :  { %933 = vbcast.lane.b32.xlu1 %v879_v36, 360 }
  0x88   :  { %1240 = vbcast.lane.b32.xlu0 %v2870_v43, 256 }
  0x89   :  { %2352 = vmatmul.mubr.bf16.gmra.mrb[24].mxu0 %v102_v39 }
  0x8a   :  { %2355 = vmatprep.mubr.bf16.mxu0 %v104_v40 }
  0x8b   :  { %941 = vbcast.lane.b32.xlu1 %v879_v36, 376 }
  0x8c   :  { %1248 = vbcast.lane.b32.xlu0 %v2870_v43, 272 }
  0x8f   :  { %1244 = vbcast.lane.b32.xlu1 %v2870_v43, 264 }
  0x90   :  { %1256 = vbcast.lane.b32.xlu0 %v2870_v43, 288 }
  0x91   :  { %2356 = vmatmul.mubr.bf16.gmra.mrb[28].mxu0 %v106_v41 }
  0x93   :  { %1252 = vbcast.lane.b32.xlu1 %v2870_v43, 280 }
  0x94   :  { %1307 = vbcast.lane.b32.xlu0 %v2877_v44, 256 }
  0x97   :  { %1260 = vbcast.lane.b32.xlu1 %v2870_v43, 296 }
  0x98   :  { %1315 = vbcast.lane.b32.xlu0 %v2877_v44, 272 }
  0x9b   :  { %1311 = vbcast.lane.b32.xlu1 %v2877_v44, 264 }
  0x9c   :  { %1323 = vbcast.lane.b32.xlu0 %v2877_v44, 288 }
  0x9f   :  { %1319 = vbcast.lane.b32.xlu1 %v2877_v44, 280 }
  0xa0   :  { %1264 = vbcast.lane.b32.xlu0 %v2870_v43, 304 }
  0xa3   :  { %1327 = vbcast.lane.b32.xlu1 %v2877_v44, 296 }
  0xa4   :  { %1268 = vbcast.lane.b32.xlu0 %v2870_v43, 312 }
  0xa7   :  { %1331 = vbcast.lane.b32.xlu1 %v2877_v44, 304 }
  0xa8   :  { %1272 = vbcast.lane.b32.xlu0 %v2870_v43, 320 }
  0xab   :  { %1335 = vbcast.lane.b32.xlu1 %v2877_v44, 312 }
  0xac   :  { %1276 = vbcast.lane.b32.xlu0 %v2870_v43, 328 }
  0xaf   :  { %1339 = vbcast.lane.b32.xlu1 %v2877_v44, 320 }
  0xb0   :  { %1280 = vbcast.lane.b32.xlu0 %v2870_v43, 336 }
  0xb3   :  { %1343 = vbcast.lane.b32.xlu1 %v2877_v44, 328 }
  0xb4   :  { %1284 = vbcast.lane.b32.xlu0 %v2870_v43, 344 }
  0xb7   :  { %1347 = vbcast.lane.b32.xlu1 %v2877_v44, 336 }
  0xb8   :  { %1288 = vbcast.lane.b32.xlu0 %v2870_v43, 352 }
  0xbb   :  { %1351 = vbcast.lane.b32.xlu1 %v2877_v44, 344 }
  0xbc   :  { %1292 = vbcast.lane.b32.xlu0 %v2870_v43, 360 }
  0xbd   :  { %v2905_v45 = vpop.permute.xlu1 %818 }
  0xbe   :  { %v2911_v48 = vpop.permute.xlu0 %814 }
  0xbf   :  { %1355 = vbcast.lane.b32.xlu1 %v2877_v44, 352 }
  0xc0   :  { %1296 = vbcast.lane.b32.xlu0 %v2870_v43, 368 }
  0xc1   :  { %v2907_v46 = vpop.permute.xlu1 %822 }
  0xc2   :  { %v2915_v52 = vpop.permute.xlu0 %830 }
  0xc3   :  { %1359 = vbcast.lane.b32.xlu1 %v2877_v44, 360 }
  0xc5   :  { %v2909_v47 = vpop.permute.xlu1 %826 }
  0xc6   :  { %v2925_v57 = vpop.permute.xlu0 %838 }
  0xc7   :  { %1363 = vbcast.lane.b32.xlu1 %v2877_v44, 368 }
  0xc9   :  { %v2913_v51 = vpop.permute.xlu1 %834 }
  0xca   :  { %v2931_v6 = vpop.permute.xlu0 %846 }
  0xcd   :  { %v2920_v55 = vpop.permute.xlu1 %842 }
  0xce   :  { %v2936_v24 = vpop.permute.xlu0 %854 }
  0xd1   :  { %v2928_v4 = vpop.permute.xlu1 %850 }
  0xd2   :  { %v2940_v31 = vpop.permute.xlu0 %862 }
  0xd3   :  { %3790 = vst [vmem:[#allocation19_spill] sm:$0xff] %v2940_v31 }
  0xd5   :  { %v2934_v18 = vpop.permute.xlu1 %858 }
  0xd9   :  { %v2938_v26 = vpop.permute.xlu1 %866 }
  0xda   :  { %3789 = vst [vmem:[#allocation18_spill] sm:$0xff] %v2938_v26 }
  0xdd   :  { %v2948_v42 = vpop.permute.xlu1 %874 }
  0xde   :  { %3791 = vst [vmem:[#allocation20_spill] sm:$0xff] %v2948_v42 }
 0x12b   :  { %v536_v58 = vpop.f32.mrb[0].mxu1 }
 0x12c   :  { %v2329_v59 = vpop.f32.mrb[0].mxu0  ;;  %v537_v60 = vadd.f32 %v2268_v54, %v536_v58  ;;  %v2377_v61 = vpop.f32.mrb[1].mxu1 }
 0x12d   :  { %v303_v62 = vpop.f32.mrb[1].mxu0  ;;  %v539_v63 = vpop.f32.mrb[2].mxu1 }
 0x12e   :  { %v2330_v0 = vpop.f32.mrb[2].mxu0  ;;  %v549_v1 = vrot.slane %v537_v60, %v2923_v56  ;;  %v2378_v2 = vpop.f32.mrb[3].mxu1 }
 0x12f   :  { %v306_v3 = vpop.f32.mrb[3].mxu0  ;;  %v2951_v54 = vpop.permute.xlu0 %870 }
 0x130   :  { %v557_v5 = vrot.slane %v549_v1, %v2923_v56  ;;  %v550_v41 = vcombine.high %v549_v1, %v549_v1  ;;  %3792 = vst [vmem:[#allocation21_spill] sm:$0xff] %v2951_v54 }
 0x132   :  { %v568_v7 = vrot.slane %v557_v5, %v2856_v23 }
 0x134   :  { %v2333_v8 = vpop.f32.mrb[4].mxu0  ;;  %v577_v9 = vadd.f32 %v2329_v59, %v568_v7  ;;  %v575_v10 = vadd.f32 %v568_v7, %v303_v62  ;;  %v578_v11 = vadd.f32 %v2330_v0, %v568_v7  ;;  %v576_v13 = vadd.f32 %v568_v7, %v306_v3 }
 0x135   :  { %v319_v12 = vpop.f32.mrb[5].mxu0  ;;  %v581_v14 = vadd.f32 %v2333_v8, %v568_v7  ;;  %v564_v0 = vrot.slane %v550_v41, %v2923_v56 }
 0x136   :  { %v579_v16 = vadd.f32 %v568_v7, %v319_v12  ;;  %v2334_v17 = vpop.f32.mrb[6].mxu0  ;;  %2443 = vtanh.f32 %v577_v9  ;;  %v2956_v9 = vpop.permute.xlu1 %885 }
 0x137   :  { %v582_v20 = vadd.f32 %v2334_v17, %v568_v7  ;;  %v322_v21 = vpop.f32.mrb[7].mxu0  ;;  %2445 = vtanh.f32 %v575_v10 }
 0x138   :  { %v580_v22 = vadd.f32 %v568_v7, %v322_v21  ;;  %2447 = vtanh.f32 %v578_v11  ;;  %v2959_v11 = vpop.permute.xlu0 %881 }
 0x139   :  { %2449 = vtanh.f32 %v576_v13  ;;  %v2962_v13 = vrot.slane %v564_v0, %v2856_v23 }
 0x13a   :  { %2451 = vtanh.f32 %v582_v20 }
 0x13b   :  { %2453 = vtanh.f32 %v581_v14 }
 0x13c   :  { %v2337_v25 = vpop.f32.mrb[8].mxu0  ;;  %2455 = vtanh.f32 %v580_v22 }
 0x13d   :  { %v585_v27 = vadd.f32 %v2337_v25, %v568_v7  ;;  %v335_v28 = vpop.f32.mrb[9].mxu0  ;;  %2457 = vtanh.f32 %v579_v16 }
 0x13e   :  { %v583_v29 = vadd.f32 %v568_v7, %v335_v28  ;;  %v2338_v30 = vpop.f32.mrb[10].mxu0 }
 0x13f   :  { %v586_v32 = vadd.f32 %v2338_v30, %v568_v7  ;;  %v338_v34 = vpop.f32.mrb[11].mxu0 }
 0x140   :  { %v584_v36 = vadd.f32 %v568_v7, %v338_v34  ;;  %v2444_v37 = vpop.eup %2443 }
 0x141   :  { %v2446_v38 = vpop.eup %2445  ;;  %v648_v39 = vmul.f32 %v2444_v37, %v2945_v35  ;;  %2459 = vtanh.f32 %v586_v32 }
 0x142   :  { %v2448_v40 = vpop.eup %2447  ;;  %v646_v49 = vmul.f32 %v2446_v38, %v2945_v35  ;;  %2461 = vtanh.f32 %v585_v27  ;;  %v2968_v27 = vpop.permute.xlu1 %893 }
 0x143   :  { %v2450_v50 = vpop.eup %2449  ;;  %682 = vadd.xlane.f32.xlu1 %v648_v39  ;;  %v649_v62 = vmul.f32 %v2448_v40, %v2945_v35  ;;  %2463 = vtanh.f32 %v584_v36  ;;  %v2973_v36 = vpop.permute.xlu0 %889 }
 0x144   :  { %v2341_v53 = vpop.f32.mrb[12].mxu0  ;;  %678 = vadd.xlane.f32.xlu0 %v646_v49  ;;  %v2452_v63 = vpop.eup %2451  ;;  %v647_v2 = vmul.f32 %v2450_v50, %v2945_v35  ;;  %2465 = vtanh.f32 %v583_v29 }
 0x145   :  { %v589_v58 = vadd.f32 %v2341_v53, %v568_v7  ;;  %v351_v59 = vpop.f32.mrb[13].mxu0  ;;  %v2454_v5 = vpop.eup %2453  ;;  %v653_v10 = vmul.f32 %v2452_v63, %v2945_v35 }
 0x146   :  { %v587_v60 = vadd.f32 %v568_v7, %v351_v59  ;;  %v2342_v61 = vpop.f32.mrb[14].mxu0  ;;  %v2456_v12 = vpop.eup %2455  ;;  %v652_v56 = vmul.f32 %v2454_v5, %v2945_v35 }
 0x147   :  { %v590_v1 = vadd.f32 %v2342_v61, %v568_v7  ;;  %v354_v3 = vpop.f32.mrb[15].mxu0  ;;  %684 = vadd.xlane.f32.xlu1 %v649_v62  ;;  %v2458_v14 = vpop.eup %2457  ;;  %v651_v22 = vmul.f32 %v2456_v12, %v2945_v35 }
 0x148   :  { %v588_v8 = vadd.f32 %v568_v7, %v354_v3  ;;  %680 = vadd.xlane.f32.xlu0 %v647_v2  ;;  %v650_v29 = vmul.f32 %v2458_v14, %v2945_v35  ;;  %v2977_v49 = vpop.permute.xlu1 %901  ;;  %v2982_v61 = vpop.permute.xlu0 %897 }
 0x149   :  { %2467 = vtanh.f32 %v590_v1  ;;  %3793 = vst [vmem:[#allocation22_spill] sm:$0xff] %v2977_v49 }
 0x14a   :  { %2469 = vtanh.f32 %v589_v58 }
 0x14b   :  { %692 = vadd.xlane.f32.xlu1 %v653_v10  ;;  %v2460_v25 = vpop.eup %2459  ;;  %2471 = vtanh.f32 %v588_v8 }
 0x14c   :  { %v2345_v16 = vpop.f32.mrb[16].mxu0  ;;  %690 = vadd.xlane.f32.xlu0 %v652_v56  ;;  %v2462_v32 = vpop.eup %2461  ;;  %2473 = vtanh.f32 %v587_v60  ;;  %v657_v37 = vmul.f32 %v2460_v25, %v2945_v35 }
 0x14d   :  { %v593_v7 = vadd.f32 %v2345_v16, %v2962_v13  ;;  %v367_v17 = vpop.f32.mrb[17].mxu0  ;;  %v2464_v38 = vpop.eup %2463  ;;  %v656_v39 = vmul.f32 %v2462_v32, %v2945_v35 }
 0x14e   :  { %v591_v20 = vadd.f32 %v2962_v13, %v367_v17  ;;  %v2346_v21 = vpop.f32.mrb[18].mxu0  ;;  %v2466_v40 = vpop.eup %2465  ;;  %v655_v60 = vmul.f32 %v2464_v38, %v2945_v35 }
 0x14f   :  { %v594_v28 = vadd.f32 %v2346_v21, %v2962_v13  ;;  %v370_v30 = vpop.f32.mrb[19].mxu0  ;;  %688 = vadd.xlane.f32.xlu1 %v651_v22  ;;  %v654_v0 = vmul.f32 %v2466_v40, %v2945_v35  ;;  %v2988_v10 = vpop.permute.xlu1 %909 }
 0x150   :  { %v592_v34 = vadd.f32 %v2962_v13, %v370_v30  ;;  %686 = vadd.xlane.f32.xlu0 %v650_v29  ;;  %3794 = vst [vmem:[#allocation23_spill] sm:$0xff] %v2988_v10  ;;  %v2991_v16 = vpop.permute.xlu0 %905 }
 0x151   :  { %2475 = vtanh.f32 %v594_v28 }
 0x152   :  { %2477 = vtanh.f32 %v593_v7 }
 0x153   :  { %700 = vadd.xlane.f32.xlu1 %v657_v37  ;;  %v2468_v62 = vpop.eup %2467  ;;  %2479 = vtanh.f32 %v592_v34  ;;  %v2999_v37 = vpop.permute.xlu1 %917 }
 0x154   :  { %v2349_v41 = vpop.f32.mrb[20].mxu0  ;;  %698 = vadd.xlane.f32.xlu0 %v656_v39  ;;  %v2470_v2 = vpop.eup %2469  ;;  %2481 = vtanh.f32 %v591_v20  ;;  %v661_v5 = vmul.f32 %v2468_v62, %v2945_v35  ;;  %3795 = vst [vmem:[#allocation24_spill] sm:$0xff] %v2999_v37  ;;  %v2738_v62 = vmov 0  }
 0x155   :  { %v597_v50 = vadd.f32 %v2349_v41, %v2962_v13  ;;  %v383_v53 = vpop.f32.mrb[21].mxu0  ;;  %v2472_v8 = vpop.eup %2471  ;;  %v660_v12 = vmul.f32 %v2470_v2, %v2945_v35  ;;  %2392 = vset.pattern.permute.xlu1 %v2738_v62  ;;  %2391 = vset.pattern.permute.xlu0 %v2738_v62 }
 0x156   :  { %v595_v58 = vadd.f32 %v2962_v13, %v383_v53  ;;  %v2350_v59 = vpop.f32.mrb[22].mxu0  ;;  %v2474_v56 = vpop.eup %2473  ;;  %v659_v22 = vmul.f32 %v2472_v8, %v2945_v35 }
 0x157   :  { %v598_v63 = vadd.f32 %v2350_v59, %v2962_v13  ;;  %v386_v1 = vpop.f32.mrb[23].mxu0  ;;  %696 = vadd.xlane.f32.xlu1 %v655_v60  ;;  %v658_v29 = vmul.f32 %v2474_v56, %v2945_v35  ;;  %v3002_v39 = vpop.permute.xlu0 %913 }
 0x158   :  { %v596_v3 = vadd.f32 %v2962_v13, %v386_v1  ;;  %694 = vadd.xlane.f32.xlu0 %v654_v0  ;;  %3796 = vst [vmem:[#allocation25_spill] sm:$0xff] %v3002_v39  ;;  %v3008_v2 = vpop.permute.xlu1 %925 }
 0x159   :  { %2483 = vtanh.f32 %v598_v63  ;;  %3797 = vst [vmem:[#allocation26_spill] sm:$0xff] %v3008_v2 }
 0x15a   :  { %2485 = vtanh.f32 %v597_v50 }
 0x15b   :  { %708 = vadd.xlane.f32.xlu1 %v661_v5  ;;  %v2476_v25 = vpop.eup %2475  ;;  %2487 = vtanh.f32 %v596_v3 }
 0x15c   :  { %v2353_v14 = vpop.f32.mrb[24].mxu0  ;;  %706 = vadd.xlane.f32.xlu0 %v660_v12  ;;  %v2478_v32 = vpop.eup %2477  ;;  %2489 = vtanh.f32 %v595_v58  ;;  %v665_v38 = vmul.f32 %v2476_v25, %v2945_v35 }
 0x15d   :  { %v601_v7 = vadd.f32 %v2353_v14, %v2962_v13  ;;  %v399_v17 = vpop.f32.mrb[25].mxu0  ;;  %v2480_v40 = vpop.eup %2479  ;;  %v664_v41 = vmul.f32 %v2478_v32, %v2945_v35 }
 0x15e   :  { %v599_v20 = vadd.f32 %v2962_v13, %v399_v17  ;;  %v2354_v21 = vpop.f32.mrb[26].mxu0  ;;  %v2482_v50 = vpop.eup %2481  ;;  %v663_v0 = vmul.f32 %v2480_v40, %v2945_v35 }
 0x15f   :  { %v602_v28 = vadd.f32 %v2354_v21, %v2962_v13  ;;  %v402_v30 = vpop.f32.mrb[27].mxu0  ;;  %704 = vadd.xlane.f32.xlu1 %v659_v22  ;;  %v662_v5 = vmul.f32 %v2482_v50, %v2945_v35  ;;  %v3013_v14 = vpop.permute.xlu0 %921 }
 0x160   :  { %v600_v34 = vadd.f32 %v2962_v13, %v402_v30  ;;  %702 = vadd.xlane.f32.xlu0 %v658_v29  ;;  %3798 = vst [vmem:[#allocation27_spill] sm:$0xff] %v3013_v14  ;;  %v3017_v22 = vpop.permute.xlu1 %933 }
 0x161   :  { %2491 = vtanh.f32 %v602_v28  ;;  %3799 = vst [vmem:[#allocation28_spill] sm:$0xff] %v3017_v22 }
 0x162   :  { %2493 = vtanh.f32 %v601_v7 }
 0x163   :  { %716 = vadd.xlane.f32.xlu1 %v665_v38  ;;  %v2484_v1 = vpop.eup %2483  ;;  %2495 = vtanh.f32 %v599_v20  ;;  %v3019_v25 = vpop.permute.xlu0 %929 }
 0x164   :  { %v2357_v53 = vpop.f32.mrb[28].mxu0  ;;  %714 = vadd.xlane.f32.xlu0 %v664_v41  ;;  %v2486_v12 = vpop.eup %2485  ;;  %2497 = vtanh.f32 %v600_v34  ;;  %v669_v7 = vmul.f32 %v2484_v1, %v2945_v35  ;;  %3800 = vst [vmem:[#allocation29_spill] sm:$0xff] %v3019_v25 }
 0x165   :  { %v605_v59 = vadd.f32 %v2357_v53, %v2962_v13  ;;  %v415_v60 = vpop.f32.mrb[29].mxu0  ;;  %v2488_v17 = vpop.eup %2487  ;;  %v668_v20 = vmul.f32 %v2486_v12, %v2945_v35 }
 0x166   :  { %v603_v58 = vadd.f32 %v2962_v13, %v415_v60  ;;  %v2358_v63 = vpop.f32.mrb[30].mxu0  ;;  %v2490_v21 = vpop.eup %2489 }
 0x167   :  { %v606_v3 = vadd.f32 %v2358_v63, %v2962_v13  ;;  %v418_v8 = vpop.f32.mrb[31].mxu0  ;;  %712 = vadd.xlane.f32.xlu1 %v663_v0  ;;  %v666_v29 = vmul.f32 %v2490_v21, %v2945_v35  ;;  %v3024_v41 = vpop.permute.xlu1 %941 }
 0x168   :  { %v604_v56 = vadd.f32 %v2962_v13, %v418_v8  ;;  %710 = vadd.xlane.f32.xlu0 %v662_v5  ;;  %v667_v13 = vmul.f32 %v2488_v17, %v2945_v35  ;;  %3801 = vst [vmem:[#allocation30_spill] sm:$0xff] %v3024_v41 }
 0x169   :  { %2499 = vtanh.f32 %v606_v3 }
 0x16a   :  { %2501 = vtanh.f32 %v604_v56 }
 0x16b   :  { %724 = vadd.xlane.f32.xlu1 %v669_v7  ;;  %2503 = vtanh.f32 %v605_v59  ;;  %v2492_v28 = vpop.eup %2491  ;;  %v3027_v59 = vpop.permute.xlu0 %937 }
 0x16c   :  { %722 = vadd.xlane.f32.xlu0 %v668_v20  ;;  %v2494_v30 = vpop.eup %2493  ;;  %2505 = vtanh.f32 %v603_v58  ;;  %v673_v38 = vmul.f32 %v2492_v28, %v2945_v35  ;;  %3802 = vst [vmem:[#allocation31_spill] sm:$0xff] %v3027_v59  ;;  %v3033_v1 = vpop.permute.xlu1 %1244 }
 0x16d   :  { %v2496_v32 = vpop.eup %2495  ;;  %v672_v50 = vmul.f32 %v2494_v30, %v2945_v35 }
 0x16e   :  { %v2498_v34 = vpop.eup %2497  ;;  %v670_v58 = vmul.f32 %v2496_v32, %v2945_v35 }
 0x16f   :  { %720 = vadd.xlane.f32.xlu1 %v667_v13  ;;  %v671_v63 = vmul.f32 %v2498_v34, %v2945_v35  ;;  %v3035_v3 = vpop.permute.xlu0 %1240 }
 0x170   :  { %718 = vadd.xlane.f32.xlu0 %v666_v29  ;;  %v3038_v12 = vpop.permute.xlu1 %1252 }
 0x173   :  { %v2500_v40 = vpop.eup %2499  ;;  %732 = vadd.xlane.f32.xlu1 %v673_v38  ;;  %v3041_v7 = vpop.permute.xlu0 %1248 }
 0x174   :  { %v2502_v53 = vpop.eup %2501  ;;  %v677_v60 = vmul.f32 %v2500_v40, %v2945_v35  ;;  %730 = vadd.xlane.f32.xlu0 %v672_v50  ;;  %v3043_v17 = vpop.permute.xlu1 %1260 }
 0x175   :  { %v675_v62 = vmul.f32 %v2502_v53, %v2945_v35  ;;  %v2504_v0 = vpop.eup %2503 }
 0x176   :  { %v676_v5 = vmul.f32 %v2504_v0, %v2945_v35  ;;  %v2506_v8 = vpop.eup %2505 }
 0x177   :  { %728 = vadd.xlane.f32.xlu1 %v671_v63  ;;  %v674_v56 = vmul.f32 %v2506_v8, %v2945_v35  ;;  %v3045_v20 = vpop.permute.xlu0 %1256 }
 0x178   :  { %726 = vadd.xlane.f32.xlu0 %v670_v58  ;;  %v3048_v21 = vpop.permute.xlu1 %1311 }
 0x17b   :  { %v3050_v13 = vpop.permute.xlu0 %1307 }
 0x17c   :  { %738 = vadd.xlane.f32.xlu0 %v676_v5  ;;  %v3052_v28 = vpop.permute.xlu1 %1319 }
 0x17f   :  { %v3054_v29 = vpop.permute.xlu0 %1315 }
 0x180   :  { %734 = vadd.xlane.f32.xlu0 %v674_v56  ;;  %v3056_v30 = vpop.permute.xlu1 %1327 }
 0x181   :  { %3803 = vst [vmem:[#allocation32_spill] sm:$0xff] %v3056_v30 }
 0x183   :  { %v3059_v35 = vpop.permute.xlu0 %1323 }
 0x184   :  { %v3061_v32 = vpop.permute.xlu1 %1331 }
 0x187   :  { %v3063_v34 = vpop.permute.xlu0 %1264 }
 0x188   :  { %1367 = vbcast.lane.b32.xlu1 %v2877_v44, 376  ;;  %v3065_v38 = vpop.permute.xlu1 %1335 }
 0x189   :  { %3804 = vst [vmem:[#allocation33_spill] sm:$0xff] %v3065_v38 }
 0x18b   :  { %v3067_v44 = vpop.permute.xlu0 %1268 }
 0x18c   :  { %v3069_v40 = vpop.permute.xlu1 %1339 }
 0x18d   :  { %3805 = vst [vmem:[#allocation34_spill] sm:$0xff] %v3069_v40 }
 0x18f   :  { %v3071_v50 = vpop.permute.xlu0 %1272 }
 0x190   :  { %v3073_v53 = vpop.permute.xlu1 %1343 }
 0x191   :  { %3806 = vst [vmem:[#allocation35_spill] sm:$0xff] %v3073_v53 }
 0x193   :  { %v3075_v63 = vpop.permute.xlu0 %1276 }
 0x196   :  { %1300 = vbcast.lane.b32.xlu0 %v2870_v43, 376  ;;  %v3077_v43 = vpop.permute.xlu1 %1347 }
 0x197   :  { %3807 = vst [vmem:[#allocation36_spill] sm:$0xff] %v3077_v43  ;;  %v3079_v58 = vpop.permute.xlu0 %1280 }
 0x19a   :  { %v3081_v0 = vpop.permute.xlu1 %1351 }
 0x19b   :  { %3808 = vst [vmem:[#allocation37_spill] sm:$0xff] %v3081_v0  ;;  %v3083_v5 = vpop.permute.xlu0 %1284  ;;  %v3815_v0 = vlaneseq }
 0x19d   :  { %v3098_v2 = vand.u32 127, %v3815_v0 }
 0x19e   :  { %v3085_v8 = vpop.permute.xlu1 %1355 }
 0x19f   :  { %3809 = vst [vmem:[#allocation38_spill] sm:$0xff] %v3085_v8  ;;  %v3087_v56 = vpop.permute.xlu0 %1288  ;;  %v1045_v42 = vadd.s32 4294967288, %v3098_v2  ;;  %v1052_v39 = vadd.s32 4294967280, %v3098_v2  ;;  %v1087_v54 = vadd.s32 4294967240, %v3098_v2 }
 0x1a0   :  { %3810 = vst [vmem:[#allocation39_spill] sm:$0xff] %v3087_v56 }
 0x1a1   :  { %v3108_v0 = vsub.s32 %v1045_v42, %v2853_v19  ;;  %v3112_v43 = vsub.s32 %v1052_v39, %v2853_v19  ;;  %v1073_v39 = vadd.s32 4294967256, %v3098_v2 }
 0x1a2   :  { %v3089_v15 = vpop.permute.xlu1 %1359 }
 0x1a3   :  { %3811 = vst [vmem:[#allocation40_spill] sm:$0xff] %v3089_v15 }
 0x1a6   :  { %v3093_v33 = vpop.permute.xlu1 %1363 }
 0x1a7   :  { %3813 = vst [vmem:[#allocation42_spill] sm:$0xff] %v3093_v33 }
 0x1ac   :  { %740 = vadd.xlane.f32.xlu1 %v677_v60  ;;  %v3091_v60 = vpop.permute.xlu0 %1292 }
 0x1ad   :  { %3812 = vst [vmem:[#allocation41_spill] sm:$0xff] %v3091_v60  ;;  %v1066_v60 = vadd.s32 4294967264, %v3098_v2 }
 0x1b0   :  { %736 = vadd.xlane.f32.xlu1 %v675_v62  ;;  %v3095_v23 = vpop.permute.xlu0 %1296 }
 0x1b1   :  { %3814 = vst [vmem:[#allocation43_spill] sm:$0xff] %v3095_v23 }
 0x1d0   :  { %v683_v62 = vpop.xlane.xlu1 %682 }
 0x1d1   :  { %v679_v41 = vpop.xlane.xlu0 %678  ;;  %v746_v22 = vmul.f32 1.442695, %v683_v62 }
 0x1d2   :  { %v742_v25 = vmul.f32 1.442695, %v679_v41  ;;  %v1059_v41 = vadd.s32 4294967272, %v3098_v2 }
 0x1d4   :  { %2507 = vpow2.f32 %v742_v25  ;;  %v685_v59 = vpop.xlane.xlu1 %684 }
 0x1d5   :  { %v748_v53 = vmul.f32 1.442695, %v685_v59  ;;  %v681_v37 = vpop.xlane.xlu0 %680  ;;  %2509 = vpow2.f32 %v746_v22 }
 0x1d6   :  { %v744_v8 = vmul.f32 1.442695, %v681_v37 }
 0x1d7   :  { %2511 = vpow2.f32 %v748_v53  ;;  %v3105_v53 = vsub.s32 %v3098_v2, %v2853_v19 }
 0x1d8   :  { %2513 = vpow2.f32 %v744_v8  ;;  %v693_v15 = vpop.xlane.xlu1 %692 }
 0x1d9   :  { %v691_v40 = vpop.xlane.xlu0 %690  ;;  %v756_v62 = vmul.f32 1.442695, %v693_v15  ;;  %v3115_v15 = vsub.s32 %v1059_v41, %v2853_v19 }
 0x1da   :  { %v754_v33 = vmul.f32 1.442695, %v691_v40 }
 0x1dc   :  { %v689_v25 = vpop.xlane.xlu1 %688  ;;  %2515 = vpow2.f32 %v754_v33 }
 0x1dd   :  { %v687_v59 = vpop.xlane.xlu0 %686  ;;  %v752_v23 = vmul.f32 1.442695, %v689_v25 }
 0x1de   :  { %v2508_v22 = vpop.eup %2507  ;;  %v750_v37 = vmul.f32 1.442695, %v687_v59 }
 0x1df   :  { %2517 = vpow2.f32 %v752_v23  ;;  %v975_v40 = vmul.f32 %v2508_v22, %v2911_v48  ;;  %v2510_v8 = vpop.eup %2509  ;;  %v1080_v48 = vadd.s32 4294967248, %v3098_v2  ;;  %v1044_v41 = vrot.slane %v2508_v22, %v3105_v53 }
 0x1e0   :  { %2519 = vpow2.f32 %v750_v37  ;;  %v701_v33 = vpop.xlane.xlu1 %700  ;;  %v977_v26 = vmul.f32 %v2510_v8, %v2907_v46  ;;  %v3141_v46 = vsub.s32 %v1066_v60, %v2853_v19 }
 0x1e1   :  { %v2512_v25 = vpop.eup %2511  ;;  %2521 = vpow2.f32 %v756_v62  ;;  %v699_v59 = vpop.xlane.xlu0 %698  ;;  %v3118_v42 = vmul.f32 %v3035_v3, %v975_v40  ;;  %v1056_v3 = vrot.slane %v2510_v8, %v3112_v43  ;;  %v764_v40 = vmul.f32 1.442695, %v701_v33 }
 0x1e2   :  { %v2514_v23 = vpop.eup %2513  ;;  %v762_v14 = vmul.f32 1.442695, %v699_v59  ;;  %v1063_v49 = vrot.slane %v2512_v25, %v3115_v15  ;;  %v978_v60 = vmul.f32 %v2512_v25, %v2909_v47  ;;  %v1108_v47 = vadd.s32 4294967216, %v3098_v2 }
 0x1e3   :  { %3816 = vst [vmem:[#allocation44_spill] sm:$0xff] %v3118_v42  ;;  %v1049_v37 = vrot.slane %v2514_v23, %v3108_v0  ;;  %1466 = vperm.xlu0 %2391, %v3118_v42   ;;  %v976_v62 = vmul.f32 %v2514_v23, %v2905_v45  ;;  %v3137_v45 = vsub.s32 %v1073_v39, %v2853_v19 }
 0x1e4   :  { %v697_v30 = vpop.xlane.xlu1 %696  ;;  %2523 = vpow2.f32 %v762_v14 }
 0x1e5   :  { %v1051_v59 = vsel %vm1050_vm1, %v1049_v37, %v1044_v41  ;;  %v695_v22 = vpop.xlane.xlu0 %694  ;;  %v760_v56 = vmul.f32 1.442695, %v697_v30  ;;  %v3133_v38 = vmul.f32 %v3033_v1, %v976_v62  ;;  %v3149_v41 = vsub.s32 %v1080_v48, %v2853_v19 }
 0x1e6   :  { %v1058_v42 = vsel %vm1057_vm2, %v1056_v3, %v1051_v59  ;;  %v758_v23 = vmul.f32 1.442695, %v695_v22  ;;  %v2516_v8 = vpop.eup %2515  ;;  %v1101_v37 = vadd.s32 4294967224, %v3098_v2  ;;  %v1094_v3 = vadd.s32 4294967232, %v3098_v2 }
 0x1e7   :  { %3817 = vst [vmem:[#allocation45_spill] sm:$0xff] %v3133_v38  ;;  %v1065_v33 = vsel %vm1064_vm3, %v1063_v49, %v1058_v42  ;;  %2525 = vpow2.f32 %v760_v56  ;;  %1469 = vperm.xlu1 %2392, %v3133_v38   ;;  %v3154_v49 = vmul.f32 %v3041_v7, %v977_v26  ;;  %v3158_v42 = vsub.s32 %v1087_v54, %v2853_v19 }
 0x1e8   :  { %2527 = vpow2.f32 %v758_v23  ;;  %v3144_v30 = vpop.xlane.xlu1 %708  ;;  %v1115_v26 = vadd.s32 4294967208, %v3098_v2  ;;  %v1084_v7 = vrot.slane %v2516_v8, %v3149_v41  ;;  %v3173_v59 = vmul.f32 %v3038_v12, %v978_v60 }
 0x1e9   :  { %v3146_v1 = vpop.eup %2517  ;;  %2529 = vpow2.f32 %v764_v40  ;;  %v3151_v14 = vpop.xlane.xlu0 %706  ;;  %3818 = vst [vmem:[#allocation46_spill] sm:$0xff] %v3154_v49  ;;  %v981_v22 = vmul.f32 %v2516_v8, %v2925_v57  ;;  %v3182_v10 = vsub.s32 %v1094_v3, %v2853_v19  ;;  %v3190_v60 = vsub.s32 %v1108_v47, %v2853_v19 }
 0x1ea   :  { %v2520_v56 = vpop.eup %2519  ;;  %v1077_v39 = vrot.slane %v3146_v1, %v3137_v45  ;;  %3819 = vst [vmem:[#allocation47_spill] sm:$0xff] %v3173_v59 }
 0x1eb   :  { %v2522_v48 = vpop.eup %2521  ;;  %v1070_v62 = vrot.slane %v2520_v56, %v3141_v46  ;;  %1472 = vperm.xlu1 %2392, %v3154_v49   ;;  %v3178_v49 = vsub.s32 %v1101_v37, %v2853_v19  ;;  %v979_v3 = vmul.f32 %v2520_v56, %v2915_v52 }
 0x1ec   :  { %v3168_v54 = vpop.xlane.xlu1 %704  ;;  %v1091_v23 = vrot.slane %v2522_v48, %v3158_v42 }
 0x1ed   :  { %v1072_v25 = vsel %vm1071_vm4, %v1070_v62, %v1065_v33  ;;  %v703_v40 = vpop.xlane.xlu0 %702 }
 0x1ee   :  { %v766_v38 = vmul.f32 1.442695, %v703_v40  ;;  %v1079_v31 = vsel %vm1078_vm5, %v1077_v39, %v1072_v25  ;;  %v2524_v62 = vpop.eup %2523  ;;  %v3193_v39 = vmul.f32 %v3063_v34, %v981_v22  ;;  %v982_v34 = vmul.f32 %v2522_v48, %v2920_v55 }
 0x1ef   :  { %1475 = vperm.xlu1 %2392, %v3173_v59   ;;  %v1086_v33 = vsel %vm1085_vm6, %v1084_v7, %v1079_v31  ;;  %v3197_v31 = vsub.s32 %v1115_v26, %v2853_v19  ;;  %v1112_v56 = vrot.slane %v2524_v62, %v3190_v60 }
 0x1f0   :  { %2531 = vpow2.f32 %v766_v38  ;;  %v717_v12 = vpop.xlane.xlu1 %716  ;;  %v1093_v57 = vsel %vm1092_vm7, %v1091_v23, %v1086_v33  ;;  %3820 = vst [vmem:[#allocation48_spill] sm:$0xff] %v3193_v39  ;;  %v1122_v33 = vadd.s32 4294967200, %v3098_v2 }
 0x1f1   :  { %v3187_v8 = vpop.eup %2525  ;;  %v715_v37 = vpop.xlane.xlu0 %714  ;;  %v780_v40 = vmul.f32 1.442695, %v717_v12  ;;  %v3209_v12 = vmul.f32 %v3045_v20, %v979_v3 }
 0x1f2   :  { %v2528_v25 = vpop.eup %2527  ;;  %v1105_v38 = vrot.slane %v3187_v8, %v3178_v49  ;;  %v778_v7 = vmul.f32 1.442695, %v715_v37  ;;  %v3216_v59 = vsub.s32 %v1122_v33, %v2853_v19 }
 0x1f3   :  { %v3201_v23 = vpop.eup %2529  ;;  %v1098_v47 = vrot.slane %v2528_v25, %v3182_v10  ;;  %2533 = vpow2.f32 %v780_v40  ;;  %1484 = vperm.xlu1 %2392, %v3193_v39  }
 0x1f4   :  { %2535 = vpow2.f32 %v778_v7  ;;  %v713_v52 = vpop.xlane.xlu1 %712  ;;  %v1119_v40 = vrot.slane %v3201_v23, %v3197_v31 }
 0x1f5   :  { %v711_v26 = vpop.xlane.xlu0 %710  ;;  %v776_v22 = vmul.f32 1.442695, %v713_v52  ;;  %v1100_v37 = vsel %vm1099_vm8, %v1098_v47, %v1093_v57  ;;  %v3222_v57 = vmul.f32 %v3067_v44, %v982_v34  ;;  %v980_v47 = vmul.f32 %v3146_v1, %v2913_v51 }
 0x1f6   :  { %v774_v39 = vmul.f32 1.442695, %v711_v26  ;;  %v1107_v7 = vsel %vm1106_vm9, %v1105_v38, %v1100_v37  ;;  %v985_v34 = vmul.f32 %v2524_v62, %v2936_v24 }
 0x1f7   :  { %2537 = vpow2.f32 %v776_v22  ;;  %1478 = vperm.xlu1 %2392, %v3209_v12   ;;  %v1114_v55 = vsel %vm3786_vm10, %v1112_v56, %v1107_v7  ;;  %3821 = vst [vmem:[#allocation49_spill] sm:$0xff] %v3222_v57  ;;  %v3232_v44 = vmul.f32 %v3043_v17, %v980_v47 }
 0x1f8   :  { %2539 = vpow2.f32 %v774_v39  ;;  %v725_v48 = vpop.xlane.xlu1 %724  ;;  %v1121_v20 = vsel %vm1120_vm11, %v1119_v40, %v1114_v55  ;;  %v983_v55 = vmul.f32 %v2528_v25, %v2931_v6  ;;  %v3245_v24 = vmul.f32 %v3079_v58, %v985_v34 }
 0x1f9   :  { %v723_v3 = vpop.xlane.xlu0 %722  ;;  %3822 = vst [vmem:[#allocation50_spill] sm:$0xff] %v3232_v44  ;;  %v788_v7 = vmul.f32 1.442695, %v725_v48 }
 0x1fa   :  { %v3226_v38 = vpop.eup %2531  ;;  %v786_v33 = vmul.f32 1.442695, %v723_v3  ;;  %3823 = vst [vmem:[#allocation51_spill] sm:$0xff] %v3245_v24 }
 0x1fb   :  { %v1126_v52 = vrot.slane %v3226_v38, %v3216_v59  ;;  %1487 = vperm.xlu1 %2392, %v3222_v57  }
 0x1fc   :  { %2541 = vpow2.f32 %v786_v33  ;;  %v721_v39 = vpop.xlane.xlu1 %720  ;;  %v768_v33 = vmul.f32 1.442695, %v3168_v54 }
 0x1fd   :  { %v2534_v56 = vpop.eup %2533  ;;  %v719_v26 = vpop.xlane.xlu0 %718  ;;  %v784_v22 = vmul.f32 1.442695, %v721_v39  ;;  %v3236_v51 = vsel %vm1127_vm12, %v1126_v52, %v1121_v20 }
 0x1fe   :  { %v2536_v1 = vpop.eup %2535  ;;  %v782_v37 = vmul.f32 1.442695, %v719_v26  ;;  %v994_v62 = vmul.f32 %v2534_v56, %v2968_v27  ;;  %v986_v27 = vmul.f32 %v3201_v23, %v2934_v18  ;;  %v1167_v58 = vrot.slane %v2534_v56, %v3115_v15 }
 0x1ff   :  { %2543 = vpow2.f32 %v784_v22  ;;  %1481 = vperm.xlu1 %2392, %v3232_v44   ;;  %v993_v40 = vmul.f32 %v2536_v1, %v2973_v36  ;;  %v1162_v6 = vrot.slane %v2536_v1, %v3112_v43  ;;  %v770_v22 = vmul.f32 1.442695, %v3151_v14 }
 0x200   :  { %2545 = vpow2.f32 %v782_v37  ;;  %v3262_v25 = vmul.f32 %v3052_v28, %v994_v62  ;;  %v984_v23 = vmul.f32 %v3187_v8, %v2928_v4  ;;  %v3276_v34 = vmul.f32 %v3083_v5, %v986_v27 }
 0x201   :  { %v2538_v3 = vpop.eup %2537  ;;  %v3242_v17 = vmul.f32 %v3054_v29, %v993_v40  ;;  %v731_v48 = vpop.xlane.xlu0 %730  ;;  %2547 = vpow2.f32 %v788_v7  ;;  %v3255_v29 = vmul.f32 %v3071_v50, %v983_v55 }
 0x202   :  { %v2540_v20 = vpop.eup %2539  ;;  %v1157_v47 = vrot.slane %v2538_v3, %v3108_v0  ;;  %v992_v52 = vmul.f32 %v2538_v3, %v2956_v9  ;;  %2549 = vpow2.f32 %v768_v33  ;;  %v794_v18 = vmul.f32 1.442695, %v731_v48  ;;  %3825 = vst [vmem:[#allocation53_spill] sm:$0xff] %v3276_v34  ;;  %v733_v7 = vpop.xlane.xlu1 %732  ;;  %v3829_v48 = vld [vmem:[#allocation19_spill] sm:$0xff] }
 0x203   :  { %v1153_v36 = vrot.slane %v2540_v20, %v3105_v53  ;;  %1520 = vperm.xlu0 %2391, %v3242_v17   ;;  %1496 = vperm.xlu1 %2392, %v3245_v24   ;;  %3824 = vst [vmem:[#allocation52_spill] sm:$0xff] %v3255_v29  ;;  %2551 = vpow2.f32 %v770_v22  ;;  %v991_v5 = vmul.f32 %v2540_v20, %v2959_v11  ;;  %v3833_v22 = vld [vmem:[#allocation22_spill] sm:$0xff] }
 0x204   :  { %v3273_v9 = vmul.f32 %v3048_v21, %v992_v52  ;;  %2553 = vpow2.f32 %v794_v18  ;;  %v3284_v21 = vmul.f32 %v3075_v63, %v984_v23  ;;  %v796_v63 = vmul.f32 1.442695, %v733_v7 }
 0x205   :  { %v1158_v54 = vsel %vm1050_vm1, %v1157_v47, %v1153_v36  ;;  %v727_v56 = vpop.xlane.xlu0 %726  ;;  %v772_v47 = vmul.f32 1.442695, %v3144_v30  ;;  %v3828_v36 = vld [vmem:[#allocation23_spill] sm:$0xff] }
 0x206   :  { %v2542_v39 = vpop.eup %2541  ;;  %v1163_v26 = vsel %vm1057_vm2, %v1162_v6, %v1158_v54  ;;  %v790_v4 = vmul.f32 1.442695, %v727_v56  ;;  %3826 = vst [vmem:[#allocation54_spill] sm:$0xff] %v3284_v21  ;;  %v729_v20 = vpop.xlane.xlu1 %728  ;;  %v987_v6 = vmul.f32 %v3226_v38, %v3829_v48 }
 0x207   :  { %v1168_v50 = vsel %vm1064_vm3, %v1167_v58, %v1163_v26  ;;  %1523 = vperm.xlu0 %2391, %v3262_v25   ;;  %1490 = vperm.xlu1 %2392, %v3255_v29   ;;  %v997_v14 = vmul.f32 %v2542_v39, %v2991_v16  ;;  %v1182_v16 = vrot.slane %v2542_v39, %v3149_v41  ;;  %v3831_v39 = vld [vmem:[#allocation39_spill] sm:$0xff] }
 0x208   :  { %2555 = vpow2.f32 %v790_v4  ;;  %v3322_v26 = vmul.f32 %v3831_v39, %v987_v6  ;;  %v3839_v4 = vld [vmem:[#allocation27_spill] sm:$0xff] }
 0x209   :  { %v2544_v28 = vpop.eup %2543  ;;  %v3290_v55 = vmul.f32 %v3061_v32, %v997_v14  ;;  %2557 = vpow2.f32 %v772_v47  ;;  %v739_v58 = vpop.xlane.xlu0 %738 }
 0x20a   :  { %v2546_v1 = vpop.eup %2545  ;;  %v1177_v37 = vrot.slane %v2544_v28, %v3137_v45  ;;  %2559 = vpow2.f32 %v796_v63  ;;  %3832 = vst [vmem:[#allocation23_spill] sm:$0xff] %v3322_v26  ;;  %v996_v38 = vmul.f32 %v2544_v28, %v3833_v22  ;;  %v802_v56 = vmul.f32 1.442695, %v739_v58  ;;  %v3847_v22 = vld [vmem:[#allocation34_spill] sm:$0xff] }
 0x20b   :  { %v1172_v40 = vrot.slane %v2546_v1, %v3141_v46  ;;  %1517 = vperm.xlu0 %2391, %v3273_v9   ;;  %1499 = vperm.xlu1 %2392, %v3276_v34   ;;  %3827 = vst [vmem:[#allocation55_spill] sm:$0xff] %v3290_v55  ;;  %v995_v3 = vmul.f32 %v2546_v1, %v2982_v61  ;;  %v3293_v62 = vpop.eup %2547  ;;  %v3835_v1 = vld [vmem:[#allocation32_spill] sm:$0xff] }
 0x20c   :  { %v3306_v61 = vmul.f32 %v3050_v13, %v991_v5  ;;  %v998_v30 = vmul.f32 %v3293_v62, %v3828_v36  ;;  %v3312_v27 = vpop.eup %2549  ;;  %v3830_v13 = vld [vmem:[#allocation33_spill] sm:$0xff] }
 0x20d   :  { %v1173_v8 = vsel %vm1071_vm4, %v1172_v40, %v1168_v50  ;;  %v3303_v32 = vmul.f32 %v3059_v35, %v995_v3  ;;  %v792_v35 = vmul.f32 1.442695, %v729_v20  ;;  %v3316_v54 = vpop.eup %2551  ;;  %v3834_v50 = vld [vmem:[#allocation18_spill] sm:$0xff]  ;;  %v735_v14 = vpop.xlane.xlu0 %734  ;;  %v3837_v40 = vld [vmem:[#allocation41_spill] sm:$0xff]  ;;  %v3842_v20 = vld [vmem:[#allocation43_spill] sm:$0xff] }
 0x20e   :  { %v1178_v33 = vsel %vm1078_vm5, %v1177_v37, %v1173_v8  ;;  %v3319_v52 = vmul.f32 %v3830_v13, %v998_v30  ;;  %v988_v18 = vmul.f32 %v3312_v27, %v3834_v50  ;;  %v3327_v23 = vpop.eup %2553  ;;  %v3332_v37 = vmul.f32 %v3835_v1, %v996_v38  ;;  %v3840_v5 = vld [vmem:[#allocation21_spill] sm:$0xff]  ;;  %v3848_v50 = vld [vmem:[#allocation26_spill] sm:$0xff] }
 0x20f   :  { %1532 = vperm.xlu0 %2391, %v3290_v55   ;;  %1493 = vperm.xlu1 %2392, %v3284_v21   ;;  %v3300_v11 = vsel %vm1085_vm6, %v1182_v16, %v1178_v33  ;;  %2561 = vpow2.f32 %v792_v35  ;;  %v1001_v28 = vmul.f32 %v3327_v23, %v3839_v4  ;;  %v989_v16 = vmul.f32 %v3316_v54, %v3840_v5  ;;  %v3841_v33 = vld [vmem:[#allocation36_spill] sm:$0xff]  ;;  %v3844_v30 = vld [vmem:[#allocation25_spill] sm:$0xff]  ;;  %v3851_v5 = vld [vmem:[#allocation35_spill] sm:$0xff] }
 0x210   :  { %3836 = vst [vmem:[#allocation19_spill] sm:$0xff] %v3332_v37  ;;  %v3335_v7 = vmul.f32 %v3837_v40, %v988_v18  ;;  %2563 = vpow2.f32 %v802_v56  ;;  %v798_v47 = vmul.f32 1.442695, %v735_v14  ;;  %v3845_v35 = vld [vmem:[#allocation20_spill] sm:$0xff]  ;;  %v3849_v14 = vld [vmem:[#allocation37_spill] sm:$0xff] }
 0x211   :  { %v3346_v63 = vmul.f32 %v3841_v33, %v1001_v28  ;;  %v3349_v36 = vmul.f32 %v3842_v20, %v989_v16  ;;  %v1301_v58 = vpop.permute.xlu0 %1300  ;;  %v3850_v40 = vld [vmem:[#allocation24_spill] sm:$0xff] }
 0x212   :  { %3838 = vst [vmem:[#allocation33_spill] sm:$0xff] %v3335_v7  ;;  %v2556_v8 = vpop.eup %2555  ;;  %2565 = vpow2.f32 %v798_v47  ;;  %v3852_v47 = vld [vmem:[#allocation31_spill] sm:$0xff] }
 0x213   :  { %1526 = vperm.xlu0 %2391, %v3303_v32   ;;  %1514 = vperm.xlu1 %2392, %v3306_v61   ;;  %v3343_v3 = vpop.eup %2557  ;;  %3843 = vst [vmem:[#allocation39_spill] sm:$0xff] %v3349_v36  ;;  %v999_v48 = vmul.f32 %v2556_v8, %v3844_v30  ;;  %v3853_v30 = vld [vmem:[#allocation42_spill] sm:$0xff] }
 0x214   :  { %v2560_v6 = vpop.eup %2559  ;;  %v990_v13 = vmul.f32 %v3343_v3, %v3845_v35 }
 0x215   :  { %v3359_v38 = vmul.f32 %v3847_v22, %v999_v48  ;;  %v1002_v18 = vmul.f32 %v2560_v6, %v3848_v50  ;;  %v1368_v50 = vpop.permute.xlu1 %1367 }
 0x216   :  { %v3356_v39 = vmul.f32 %v1301_v58, %v990_v13  ;;  %v3854_v58 = vld [vmem:[#allocation29_spill] sm:$0xff]  ;;  %v3855_v13 = vld [vmem:[#allocation38_spill] sm:$0xff] }
 0x217   :  { %1535 = vperm.xlu0 %2391, %v3319_v52   ;;  %1502 = vperm.xlu1 %2392, %v3322_v26   ;;  %v3365_v1 = vmul.f32 %v3849_v14, %v1002_v18 }
 0x218   :  { %3846 = vst [vmem:[#allocation22_spill] sm:$0xff] %v3356_v39 }
 0x219   :  { %v2562_v56 = vpop.eup %2561 }
 0x21a   :  { %v1000_v4 = vmul.f32 %v2562_v56, %v3850_v40  ;;  %v2564_v28 = vpop.eup %2563  ;;  %v1129_v40 = vadd.s32 4294967192, %v3098_v2 }
 0x21b   :  { %1529 = vperm.xlu0 %2391, %v3332_v37   ;;  %1505 = vperm.xlu1 %2392, %v3335_v7   ;;  %v1005_v33 = vmul.f32 %v2564_v28, %v3852_v47 }
 0x21c   :  { %v3370_v16 = vmul.f32 %v3851_v5, %v1000_v4  ;;  %v2566_v20 = vpop.eup %2565  ;;  %v1192_v5 = vrot.slane %v2556_v8, %v3182_v10  ;;  %v1143_v8 = vadd.s32 4294967176, %v3098_v2 }
 0x21d   :  { %v3375_v48 = vmul.f32 %v3853_v30, %v1005_v33  ;;  %v1003_v35 = vmul.f32 %v2566_v20, %v3854_v58  ;;  %v1187_v33 = vrot.slane %v3293_v62, %v3158_v42  ;;  %v3388_v30 = vsub.s32 %v1129_v40, %v2853_v19 }
 0x21e   :  { %v1197_v58 = vrot.slane %v2562_v56, %v3178_v49  ;;  %v1202_v56 = vrot.slane %v3327_v23, %v3190_v60  ;;  %v1212_v40 = vrot.slane %v2566_v20, %v3216_v59 }
 0x21f   :  { %1544 = vperm.xlu0 %2391, %v3346_v63   ;;  %1508 = vperm.xlu1 %2392, %v3349_v36   ;;  %v3380_v22 = vmul.f32 %v3855_v13, %v1003_v35  ;;  %v1188_v35 = vsel %vm1092_vm7, %v1187_v33, %v3300_v11  ;;  %v1136_v13 = vadd.s32 4294967184, %v3098_v2  ;;  %v3405_v11 = vsub.s32 %v1143_v8, %v2853_v19 }
 0x223   :  { %1538 = vperm.xlu0 %2391, %v3359_v38   ;;  %1511 = vperm.xlu1 %2392, %v3356_v39  }
 0x227   :  { %1547 = vperm.xlu0 %2391, %v3365_v1  }
 0x22b   :  { %1541 = vperm.xlu0 %2391, %v3370_v16  }
 0x22f   :  { %1556 = vperm.xlu0 %2391, %v3375_v48  }
 0x233   :  { %1550 = vperm.xlu0 %2391, %v3380_v22  }
 0x239   :  { %v741_v18 = vpop.xlane.xlu1 %740 }
 0x23a   :  { %v804_v14 = vmul.f32 1.442695, %v741_v18  ;;  %v1193_v18 = vsel %vm1099_vm8, %v1192_v5, %v1188_v35 }
 0x23b   :  { %v1198_v62 = vsel %vm1106_vm9, %v1197_v58, %v1193_v18 }
 0x23c   :  { %2567 = vpow2.f32 %v804_v14  ;;  %v3400_v14 = vsub.s32 %v1136_v13, %v2853_v19  ;;  %v1203_v5 = vsel %vm3786_vm10, %v1202_v56, %v1198_v62  ;;  %v3856_v19 = vld [vmem:[#allocation28_spill] sm:$0xff]  ;;  %v1147_v13 = vrot.slane %v3343_v3, %v3405_v11  ;;  %v3858_v62 = vld [vmem:[#allocation30_spill] sm:$0xff] }
 0x23d   :  { %v737_v4 = vpop.xlane.xlu1 %736 }
 0x23e   :  { %v800_v47 = vmul.f32 1.442695, %v737_v4  ;;  %v1133_v4 = vrot.slane %v3312_v27, %v3388_v30  ;;  %v1140_v58 = vrot.slane %v3316_v54, %v3400_v14  ;;  %v3857_v54 = vld [vmem:[#allocation40_spill] sm:$0xff] }
 0x240   :  { %2569 = vpow2.f32 %v800_v47  ;;  %v1207_v47 = vrot.slane %v2560_v6, %v3197_v31  ;;  %v1135_v27 = vsel %vm1134_vm13, %v1133_v4, %v3236_v51  ;;  %v1222_v6 = vrot.slane %v2564_v28, %v3400_v14 }
 0x241   :  { %v1142_v18 = vsel %vm1141_vm14, %v1140_v58, %v1135_v27  ;;  %v2573_v27 = vld [vmem:[%s3758_s3] sm:$0x3]  ;;  %s2739_s3 = smov [#allocation9]  }
 0x242   :  { %v1208_v20 = vsel %vm1120_vm11, %v1207_v47, %v1203_v5  ;;  %v1149_v3 = vsel %vm1148_vm15, %v1147_v13, %v1142_v18  ;;  %s2217_s18 = sshll.u32 %s2739_s3, 4  ;;  %s2218_s18 = int_to_ptr.vmem [resolvable:$true] %s2217_s18 }
 0x243   :  { %v1213_v51 = vsel %vm1127_vm12, %v1212_v40, %v1208_v20  ;;  %s2656_s19 = scalar_lea.vmem %s2218_s18, 32  ;;  %p2661_p11 = scmp.lt.s32.totalorder %s2218_s18, %s2218_s18 }
 0x244   :  { %p2657_p10 = scmp.ne.s32.totalorder %s2218_s18, %s2656_s19  ;;  %p2662_p12 = scmp.lt.s32.totalorder %s2656_s19, %s2656_s19 }
 0x246   :  { %v2568_v2 = vpop.eup %2567  ;;  %p2663_p13 = por %p2662_p12, %p2661_p11 }
 0x247   :  { %v1227_v8 = vrot.slane %v2568_v2, %v3405_v11  ;;  %v1006_v56 = vmul.f32 %v2568_v2, %v3858_v62 }
 0x248   :  { %p2664_p0 = pnand %p2663_p13, %p2657_p10 }
 0x249   :  { %v3433_v40 = vmul.f32 %v1368_v50, %v1006_v56 }
 0x24a   :  { %v2570_v33 = vpop.eup %2569 }
 0x24b   :  { %v1217_v23 = vrot.slane %v2570_v33, %v3388_v30  ;;  %v1004_v35 = vmul.f32 %v2570_v33, %v3856_v19 }
 0x24d   :  { %v3424_v4 = vmul.f32 %v3857_v54, %v1004_v35  ;;  %v1218_v33 = vsel %vm1134_vm13, %v1217_v23, %v1213_v51 }
 0x24e   :  { %v1223_v5 = vsel %vm1141_vm14, %v1222_v6, %v1218_v33 }
 0x24f   :  { %1553 = vperm.xlu0 %2391, %v3424_v4   ;;  %v1228_v28 = vsel %vm1148_vm15, %v1227_v8, %v1223_v5 }
 0x250   :  { %v1230_v47 = vsel %vm1229_vm0, %v1228_v28, %v1149_v3 }
 0x251   :  { %v1232_v58 = vadd.f32 %v2573_v27, %v1230_v47 }
 0x253   :  { %1559 = vperm.xlu0 %2391, %v3433_v40   ;;  %1233 = vst [vmem:[#allocation11] sm:$0x3] %v1232_v58 }
 0x262   :  { %v1467_v35 = vpop.permute.xlu0 %1466 }
 0x263   :  { %v1564_v44 = vrot.slane %v1467_v35, %v3105_v53 }
 0x266   :  { %v1470_v2 = vpop.permute.xlu1 %1469 }
 0x267   :  { %v1568_v29 = vrot.slane %v1470_v2, %v3108_v0 }
 0x26a   :  { %v1473_v23 = vpop.permute.xlu1 %1472 }
 0x26b   :  { %v1573_v55 = vrot.slane %v1473_v23, %v3112_v43 }
 0x26e   :  { %v1476_v19 = vpop.permute.xlu1 %1475 }
 0x272   :  { %v1485_v20 = vpop.permute.xlu1 %1484 }
 0x276   :  { %v1479_v6 = vpop.permute.xlu1 %1478 }
 0x27a   :  { %v1488_v51 = vpop.permute.xlu1 %1487 }
 0x27e   :  { %v1482_v50 = vpop.permute.xlu1 %1481 }
 0x27f   :  { %v1588_v2 = vrot.slane %v1482_v50, %v3137_v45 }
 0x282   :  { %v1521_v13 = vpop.permute.xlu0 %1520  ;;  %v1497_v62 = vpop.permute.xlu1 %1496 }
 0x283   :  { %v1652_v24 = vrot.slane %v1521_v13, %v3112_v43  ;;  %v1583_v13 = vrot.slane %v1479_v6, %v3141_v46 }
 0x286   :  { %v1524_v18 = vpop.permute.xlu0 %1523  ;;  %v1491_v33 = vpop.permute.xlu1 %1490 }
 0x287   :  { %v1657_v57 = vrot.slane %v1524_v18, %v3115_v15 }
 0x28a   :  { %v1518_v8 = vpop.permute.xlu0 %1517  ;;  %v3439_v3 = vpop.permute.xlu1 %1499 }
 0x28b   :  { %v1647_v7 = vrot.slane %v1518_v8, %v3108_v0 }
 0x28e   :  { %v1533_v54 = vpop.permute.xlu0 %1532  ;;  %v1494_v47 = vpop.permute.xlu1 %1493 }
 0x292   :  { %v1527_v56 = vpop.permute.xlu0 %1526  ;;  %v1515_v58 = vpop.permute.xlu1 %1514 }
 0x293   :  { %v1643_v36 = vrot.slane %v1515_v58, %v3105_v53  ;;  %v1578_v58 = vrot.slane %v1476_v19, %v3115_v15 }
 0x295   :  { %v1648_v26 = vsel %vm1050_vm1, %v1647_v7, %v1643_v36 }
 0x296   :  { %v1536_v5 = vpop.permute.xlu0 %1535  ;;  %v1653_v21 = vsel %vm1057_vm2, %v1652_v24, %v1648_v26  ;;  %v1503_v37 = vpop.permute.xlu1 %1502  ;;  %v1662_v24 = vrot.slane %v1527_v56, %v3141_v46  ;;  %v1569_v26 = vsel %vm1050_vm1, %v1568_v29, %v1564_v44  ;;  %v1593_v44 = vrot.slane %v1485_v20, %v3149_v41 }
 0x297   :  { %v1658_v8 = vsel %vm1064_vm3, %v1657_v57, %v1653_v21  ;;  %v1574_v23 = vsel %vm1057_vm2, %v1573_v55, %v1569_v26  ;;  %v1672_v21 = vrot.slane %v1533_v54, %v3149_v41  ;;  %v1677_v50 = vrot.slane %v1536_v5, %v3158_v42 }
 0x298   :  { %v1663_v18 = vsel %vm1071_vm4, %v1662_v24, %v1658_v8  ;;  %v1579_v35 = vsel %vm1064_vm3, %v1578_v58, %v1574_v23  ;;  %v1598_v54 = vrot.slane %v1488_v51, %v3158_v42  ;;  %v1613_v51 = vrot.slane %v1497_v62, %v3190_v60 }
 0x299   :  { %v1584_v57 = vsel %vm1071_vm4, %v1583_v13, %v1579_v35  ;;  %v1608_v13 = vrot.slane %v1494_v47, %v3178_v49 }
 0x29a   :  { %v1530_v28 = vpop.permute.xlu0 %1529  ;;  %v1589_v6 = vsel %vm1078_vm5, %v1588_v2, %v1584_v57  ;;  %v1623_v57 = vrot.slane %v1503_v37, %v3216_v59 }
 0x29b   :  { %v1667_v7 = vrot.slane %v1530_v28, %v3137_v45  ;;  %v1506_v28 = vpop.permute.xlu1 %1505  ;;  %v1594_v8 = vsel %vm1085_vm6, %v1593_v44, %v1589_v6  ;;  %v1618_v44 = vrot.slane %v3439_v3, %v3197_v31 }
 0x29c   :  { %v1599_v2 = vsel %vm1092_vm7, %v1598_v54, %v1594_v8 }
 0x29d   :  { %v1668_v19 = vsel %vm1078_vm5, %v1667_v7, %v1663_v18  ;;  %v1603_v7 = vrot.slane %v1491_v33, %v3182_v10 }
 0x29e   :  { %v1545_v27 = vpop.permute.xlu0 %1544  ;;  %v1673_v29 = vsel %vm1085_vm6, %v1672_v21, %v1668_v19 }
 0x29f   :  { %v1678_v24 = vsel %vm1092_vm7, %v1677_v50, %v1673_v29  ;;  %v1509_v26 = vpop.permute.xlu1 %1508  ;;  %v1692_v23 = vrot.slane %v1545_v27, %v3190_v60  ;;  %v1628_v27 = vrot.slane %v1506_v28, %v3388_v30 }
 0x2a2   :  { %v1539_v39 = vpop.permute.xlu0 %1538 }
 0x2a3   :  { %v1682_v55 = vrot.slane %v1539_v39, %v3182_v10  ;;  %v1512_v21 = vpop.permute.xlu1 %1511 }
 0x2a5   :  { %v1683_v20 = vsel %vm1099_vm8, %v1682_v55, %v1678_v24  ;;  %v1633_v55 = vrot.slane %v1509_v26, %v3400_v14 }
 0x2a6   :  { %v1548_v34 = vpop.permute.xlu0 %1547 }
 0x2a7   :  { %v1697_v35 = vrot.slane %v1548_v34, %v3197_v31 }
 0x2aa   :  { %v1542_v36 = vpop.permute.xlu0 %1541 }
 0x2ab   :  { %v1687_v58 = vrot.slane %v1542_v36, %v3178_v49  ;;  %v1604_v36 = vsel %vm1099_vm8, %v1603_v7, %v1599_v2 }
 0x2ac   :  { %v1609_v33 = vsel %vm1106_vm9, %v1608_v13, %v1604_v36  ;;  %v3859_v36 = vld [vmem:[#allocation16_spill] sm:$0xff] }
 0x2ad   :  { %v1688_v39 = vsel %vm1106_vm9, %v1687_v58, %v1683_v20  ;;  %v1614_v19 = vsel %vm3786_vm10, %v1613_v51, %v1609_v33  ;;  %v1638_v58 = vrot.slane %v1512_v21, %v3405_v11  ;;  %v3860_v33 = vld [vmem:[#allocation17_spill] sm:$0xff] }
 0x2ae   :  { %v1557_v56 = vpop.permute.xlu0 %1556  ;;  %v1693_v47 = vsel %vm3786_vm10, %v1692_v23, %v1688_v39  ;;  %v1619_v34 = vsel %vm1120_vm11, %v1618_v44, %v1614_v19  ;;  %vm1721_vm10 = vcmask 1041408   ;;  %v3863_v44 = vld [vmem:[#allocation46_spill] sm:$0xff] }
 0x2af   :  { %v1698_v29 = vsel %vm1120_vm11, %v1697_v35, %v1693_v47  ;;  %v1624_v8 = vsel %vm1127_vm12, %v1623_v57, %v1619_v34  ;;  %v1712_v3 = vrot.slane %v1557_v56, %v3400_v14  ;;  %v3862_v57 = vld [vmem:[#allocation45_spill] sm:$0xff] }
 0x2b0   :  { %v1629_v28 = vsel %vm1134_vm13, %v1628_v27, %v1624_v8 }
 0x2b1   :  { %v1634_v13 = vsel %vm1141_vm14, %v1633_v55, %v1629_v28 }
 0x2b2   :  { %v1551_v5 = vpop.permute.xlu0 %1550  ;;  %v1639_v26 = vsel %vm1148_vm15, %v1638_v58, %v1634_v13 }
 0x2b3   :  { %v1702_v18 = vrot.slane %v1551_v5, %v3216_v59 }
 0x2b5   :  { %v1703_v50 = vsel %vm1127_vm12, %v1702_v18, %v1698_v29  ;;  %v3861_v18 = vld [vmem:[#allocation44_spill] sm:$0xff]  ;;  %v3864_v29 = vld [vmem:[#allocation47_spill] sm:$0xff] }
 0x2ce   :  { %v1554_v6 = vpop.permute.xlu0 %1553 }
 0x2cf   :  { %v1707_v62 = vrot.slane %v1554_v6, %v3388_v30 }
 0x2d1   :  { %v1708_v37 = vsel %vm1134_vm13, %v1707_v62, %v1703_v50 }
 0x2d2   :  { %v1560_v7 = vpop.permute.xlu0 %1559  ;;  %v1713_v24 = vsel %vm1141_vm14, %v1712_v3, %v1708_v37  ;;  %v3865_v37 = vld [vmem:[#allocation50_spill] sm:$0xff]  ;;  %v3868_v3 = vld [vmem:[#allocation55_spill] sm:$0xff] }
 0x2d3   :  { %v1717_v54 = vrot.slane %v1560_v7, %v3405_v11 }
 0x2d5   :  { %v1718_v20 = vsel %vm1148_vm15, %v1717_v54, %v1713_v24  ;;  %v3871_v54 = vld [vmem:[#allocation54_spill] sm:$0xff]  ;;  %v3872_v24 = vld [vmem:[#allocation51_spill] sm:$0xff] }
 0x2d6   :  { %v1719_v2 = vsel %vm1229_vm0, %v1718_v20, %v1639_v26  ;;  %v3873_v20 = vld [vmem:[#allocation53_spill] sm:$0xff] }
 0x2d7   :  { %v1722_v39 = vsel %vm1721_vm10, %v1719_v2, 0.0 }
 0x2d8   :  { %1723 = vadd.xlane.f32.xlu1 %v1722_v39  ;;  %v3874_v39 = vld [vmem:[#allocation23_spill] sm:$0xff] }
 0x365   :  { %v1724_v5 = vpop.xlane.xlu1 %1723 }
 0x366   :  { %2571 = vrcp.f32 %v1724_v5 }
 0x370   :  { %v2572_v56 = vpop.eup %2571 }
 0x371   :  { %v3506_v23 = vrot.slane %v2572_v56, %v3859_v36  ;;  %v1734_v51 = vrot.slane %v2572_v56, %v3860_v33  ;;  %v3875_v56 = vld [vmem:[#allocation33_spill] sm:$0xff]  ;;  %v3876_v33 = vld [vmem:[#allocation39_spill] sm:$0xff] }
 0x373   :  { %v1757_v47 = vmul.f32 %v1734_v51, %v3303_v32  ;;  %v1737_v35 = vmul.f32 %v3506_v23, %v3861_v18  ;;  %v1760_v19 = vmul.f32 %v1734_v51, %v3319_v52  ;;  %v1738_v21 = vmul.f32 %v3506_v23, %v3862_v57 }
 0x374   :  { %v1761_v6 = vmul.f32 %v1734_v51, %v3359_v38  ;;  %v1739_v27 = vmul.f32 %v3506_v23, %v3863_v44  ;;  %v1762_v32 = vmul.f32 %v1734_v51, %v3370_v16  ;;  %v1740_v62 = vmul.f32 %v3506_v23, %v3864_v29 }
 0x375   :  { %1862 = vperm.xlu1 %2392, %v1757_v47   ;;  %1802 = vperm.xlu0 %2391, %v1737_v35   ;;  %v1763_v52 = vmul.f32 %v1734_v51, %v3346_v63  ;;  %v1741_v55 = vmul.f32 %v3506_v23, %v3209_v12  ;;  %v1764_v38 = vmul.f32 %v1734_v51, %v3365_v1  ;;  %v3877_v47 = vld [vmem:[#allocation22_spill] sm:$0xff] }
 0x376   :  { %v1753_v50 = vmul.f32 %v1734_v51, %v3306_v61  ;;  %v1765_v16 = vmul.f32 %v1734_v51, %v3380_v22  ;;  %v1754_v34 = vmul.f32 %v1734_v51, %v3273_v9  ;;  %v1766_v58 = vmul.f32 %v1734_v51, %v3424_v4  ;;  %v3866_v9 = vld [vmem:[#allocation19_spill] sm:$0xff]  ;;  %v3867_v4 = vld [vmem:[#allocation48_spill] sm:$0xff] }
 0x377   :  { %v1755_v63 = vmul.f32 %v1734_v51, %v3242_v17  ;;  %v1767_v12 = vmul.f32 %v1734_v51, %v3375_v48  ;;  %v1756_v1 = vmul.f32 %v1734_v51, %v3262_v25  ;;  %v1768_v61 = vmul.f32 %v1734_v51, %v3433_v40  ;;  %v3869_v25 = vld [vmem:[#allocation49_spill] sm:$0xff]  ;;  %v3870_v40 = vld [vmem:[#allocation52_spill] sm:$0xff] }
 0x378   :  { %v1742_v22 = vmul.f32 %v3506_v23, %v3865_v37  ;;  %v1758_v8 = vmul.f32 %v1734_v51, %v3866_v9  ;;  %v1743_v17 = vmul.f32 %v3506_v23, %v3867_v4  ;;  %v1759_v48 = vmul.f32 %v1734_v51, %v3868_v3 }
 0x379   :  { %1871 = vperm.xlu1 %2392, %v1760_v19   ;;  %1805 = vperm.xlu0 %2391, %v1738_v21   ;;  %v1744_v7 = vmul.f32 %v3506_v23, %v3869_v25  ;;  %v1745_v28 = vmul.f32 %v3506_v23, %v3870_v40  ;;  %v1746_v13 = vmul.f32 %v3506_v23, %v3871_v54  ;;  %v2576_v25 = vld [vmem:[#allocation2 + $0x50] sm:$0xff]  }
 0x37a   :  { %v1747_v26 = vmul.f32 %v3506_v23, %v3872_v24  ;;  %v1748_v2 = vmul.f32 %v3506_v23, %v3873_v20  ;;  %v1749_v5 = vmul.f32 %v3506_v23, %v3874_v39  ;;  %v1750_v36 = vmul.f32 %v3506_v23, %v3875_v56  ;;  %v2577_v20 = vld [vmem:[#allocation2 + $0x58] sm:$0xff]  }
 0x37b   :  { %v1751_v51 = vmul.f32 %v3506_v23, %v3876_v33  ;;  %v1752_v18 = vmul.f32 %v3506_v23, %v3877_v47 }
 0x37d   :  { %1874 = vperm.xlu1 %2392, %v1761_v6   ;;  %1808 = vperm.xlu0 %2391, %v1739_v27  }
 0x381   :  { %1877 = vperm.xlu1 %2392, %v1762_v32   ;;  %1811 = vperm.xlu0 %2391, %v1740_v62  }
 0x385   :  { %1880 = vperm.xlu1 %2392, %v1763_v52   ;;  %1814 = vperm.xlu0 %2391, %v1741_v55  }
 0x389   :  { %1883 = vperm.xlu1 %2392, %v1764_v38   ;;  %1850 = vperm.xlu0 %2391, %v1753_v50   ;;  %v2574_v50 = vld [vmem:[#allocation2 + $0x40] sm:$0xff]  }
 0x38d   :  { %1886 = vperm.xlu1 %2392, %v1765_v16   ;;  %1853 = vperm.xlu0 %2391, %v1754_v34   ;;  %v2075_v16 = vunpack.c.h.bf16 %v2574_v50 }
 0x391   :  { %1889 = vperm.xlu1 %2392, %v1766_v58   ;;  %1856 = vperm.xlu0 %2391, %v1755_v63   ;;  %v2074_v58 = vunpack.c.l.bf16 %v2574_v50  ;;  %v2575_v63 = vld [vmem:[#allocation2 + $0x48] sm:$0xff]   ;;  %v2579_v50 = vld [vmem:[#allocation2] sm:$0xff]  }
 0x392   :  { %v2077_v37 = vunpack.c.h.bf16 %v2575_v63 }
 0x395   :  { %1892 = vperm.xlu1 %2392, %v1767_v12   ;;  %1859 = vperm.xlu0 %2391, %v1756_v1   ;;  %v2076_v12 = vunpack.c.l.bf16 %v2575_v63 }
 0x399   :  { %1895 = vperm.xlu1 %2392, %v1768_v61   ;;  %1817 = vperm.xlu0 %2391, %v1742_v22  }
 0x39d   :  { %1865 = vperm.xlu0 %2391, %v1758_v8  }
 0x3a1   :  { %1820 = vperm.xlu0 %2391, %v1743_v17  }
 0x3a5   :  { %1868 = vperm.xlu0 %2391, %v1759_v48  }
 0x3a9   :  { %1823 = vperm.xlu0 %2391, %v1744_v7   ;;  %v2078_v7 = vunpack.c.l.bf16 %v2576_v25 }
 0x3ad   :  { %1826 = vperm.xlu0 %2391, %v1745_v28   ;;  %v2079_v28 = vunpack.c.h.bf16 %v2576_v25 }
 0x3b1   :  { %1829 = vperm.xlu0 %2391, %v1746_v13  }
 0x3b5   :  { %1832 = vperm.xlu0 %2391, %v1747_v26  }
 0x3b9   :  { %1835 = vperm.xlu0 %2391, %v1748_v2   ;;  %v2080_v2 = vunpack.c.l.bf16 %v2577_v20 }
 0x3bd   :  { %1838 = vperm.xlu0 %2391, %v1749_v5   ;;  %v2081_v5 = vunpack.c.h.bf16 %v2577_v20 }
 0x3c1   :  { %1841 = vperm.xlu0 %2391, %v1750_v36  }
 0x3c5   :  { %1844 = vperm.xlu0 %2391, %v1751_v51   ;;  %v2578_v51 = vld [vmem:[#allocation2 + $0x60] sm:$0xff]  }
 0x3c6   :  { %v2082_v47 = vunpack.c.l.bf16 %v2578_v51 }
 0x3c9   :  { %1847 = vperm.xlu0 %2391, %v1752_v18  }
 0x3f4   :  { %v3557_v35 = vpop.permute.xlu0 %1802  ;;  %v3572_v32 = vpop.permute.xlu1 %1862 }
 0x3f5   :  { %v1900_v57 = vrot.slane %v3557_v35, %v3105_v53  ;;  %v2142_v24 = vmul.f32 %v2078_v7, %v3572_v32  ;;  %v2581_v7 = vld [vmem:[#allocation2 + $0x68] sm:$0xff]  }
 0x3f8   :  { %v3559_v19 = vpop.permute.xlu0 %1805  ;;  %v3576_v62 = vpop.permute.xlu1 %1871 }
 0x3f9   :  { %v1904_v21 = vrot.slane %v3559_v19, %v3108_v0 }
 0x3fb   :  { %v3566_v6 = vsel %vm1050_vm1, %v1904_v21, %v1900_v57 }
 0x3fc   :  { %v3568_v44 = vpop.permute.xlu0 %1808  ;;  %v3578_v55 = vpop.permute.xlu1 %1874 }
 0x3fd   :  { %v2146_v25 = vmul.f32 %v2082_v47, %v3578_v55  ;;  %v2583_v47 = vld [vmem:[#allocation2 + $0x70] sm:$0xff]  }
 0x400   :  { %v3570_v27 = vpop.permute.xlu0 %1811  ;;  %v3580_v1 = vpop.permute.xlu1 %1877 }
 0x404   :  { %v3574_v23 = vpop.permute.xlu0 %1814  ;;  %v3584_v3 = vpop.permute.xlu1 %1880 }
 0x408   :  { %v1851_v29 = vpop.permute.xlu0 %1850  ;;  %v3592_v39 = vpop.permute.xlu1 %1883 }
 0x409   :  { %v2138_v9 = vmul.f32 %v2074_v58, %v1851_v29  ;;  %v1979_v58 = vrot.slane %v1851_v29, %v3105_v53  ;;  %v2084_v53 = vunpack.c.l.bf16 %v2581_v7 }
 0x40c   :  { %v1854_v52 = vpop.permute.xlu0 %1853 }
 0x40d   :  { %v2139_v61 = vmul.f32 %v2075_v16, %v1854_v52  ;;  %v1983_v36 = vrot.slane %v1854_v52, %v3108_v0  ;;  %v2059_v16 = vunpack.c.h.bf16 %v2579_v50 }
 0x40f   :  { %v2175_v4 = vadd.f32 %v2139_v61, %v2138_v9  ;;  %v2083_v61 = vunpack.c.h.bf16 %v2578_v51  ;;  %v2058_v9 = vunpack.c.l.bf16 %v2579_v50 }
 0x410   :  { %v1857_v38 = vpop.permute.xlu0 %1856 }
 0x411   :  { %v2140_v8 = vmul.f32 %v2076_v12, %v1857_v38  ;;  %v1988_v18 = vrot.slane %v1857_v38, %v3112_v43  ;;  %v2145_v12 = vmul.f32 %v2081_v5, %v3576_v62  ;;  %v1984_v38 = vsel %vm1050_vm1, %v1983_v36, %v1979_v58  ;;  %v2582_v36 = vld [vmem:[#allocation2 + $0x10] sm:$0xff]  }
 0x412   :  { %v2147_v20 = vmul.f32 %v2083_v61, %v3580_v1  ;;  %v2062_v51 = vunpack.c.l.bf16 %v2582_v36  ;;  %vm3878_vm1 = vcmask 720512  }
 0x413   :  { %v2176_v40 = vadd.f32 %v2175_v4, %v2140_v8  ;;  %v2580_v8 = vld [vmem:[#allocation2 + $0x8] sm:$0xff]   ;;  %v3599_v4 = vpop.permute.xlu1 %1886  ;;  %v1989_v29 = vsel %vm1057_vm2, %v1988_v18, %v1984_v38 }
 0x414   :  { %v1860_v34 = vpop.permute.xlu0 %1859  ;;  %v2060_v0 = vunpack.c.l.bf16 %v2580_v8  ;;  %v2061_v52 = vunpack.c.h.bf16 %v2580_v8  ;;  %v2584_v8 = vld [vmem:[#allocation2 + $0x18] sm:$0xff]  }
 0x415   :  { %v2141_v17 = vmul.f32 %v2077_v37, %v1860_v34  ;;  %v1993_v63 = vrot.slane %v1860_v34, %v3115_v15 }
 0x417   :  { %v2177_v54 = vadd.f32 %v2176_v40, %v2141_v17  ;;  %v2123_v40 = vmul.f32 %v2059_v16, %v3559_v19  ;;  %v2086_v19 = vunpack.c.l.bf16 %v2583_v47  ;;  %v3620_v16 = vpop.permute.xlu1 %1889 }
 0x418   :  { %v3582_v22 = vpop.permute.xlu0 %1817 }
 0x419   :  { %v2178_v56 = vadd.f32 %v2177_v54, %v2142_v24  ;;  %v1994_v54 = vsel %vm1064_vm3, %v1993_v63, %v1989_v29 }
 0x41c   :  { %v3586_v48 = vpop.permute.xlu0 %1865 }
 0x41d   :  { %v2143_v26 = vmul.f32 %v2079_v28, %v3586_v48  ;;  %v2085_v28 = vunpack.c.h.bf16 %v2581_v7  ;;  %v2003_v24 = vrot.slane %v3586_v48, %v3137_v45  ;;  %v2148_v48 = vmul.f32 %v2084_v53, %v3584_v3 }
 0x41e   :  { %v2126_v7 = vmul.f32 %v2062_v51, %v3574_v23  ;;  %v2150_v53 = vmul.f32 %v2086_v19, %v3599_v4 }
 0x41f   :  { %v2179_v57 = vadd.f32 %v2178_v56, %v2143_v26  ;;  %v1998_v26 = vrot.slane %v3572_v32, %v3141_v46  ;;  %v2122_v56 = vmul.f32 %v2058_v9, %v3557_v35  ;;  %v2125_v35 = vmul.f32 %v2061_v52, %v3570_v27 }
 0x420   :  { %v3588_v13 = vpop.permute.xlu0 %1820  ;;  %v2149_v63 = vmul.f32 %v2085_v28, %v3592_v39  ;;  %v2087_v9 = vunpack.c.h.bf16 %v2583_v47 }
 0x421   :  { %v2154_v50 = vadd.f32 %v2123_v40, %v2122_v56  ;;  %v2018_v40 = vrot.slane %v3578_v55, %v3182_v10  ;;  %v2023_v55 = vrot.slane %v3580_v1, %v3178_v49  ;;  %v2028_v1 = vrot.slane %v3584_v3, %v3190_v60 }
 0x422   :  { %v2151_v51 = vmul.f32 %v2087_v9, %v3620_v16 }
 0x424   :  { %v1869_v33 = vpop.permute.xlu0 %1868 }
 0x425   :  { %v2144_v21 = vmul.f32 %v2080_v2, %v1869_v33  ;;  %v2008_v2 = vrot.slane %v1869_v33, %v3149_v41  ;;  %v2063_v33 = vunpack.c.h.bf16 %v2582_v36 }
 0x427   :  { %v2180_v37 = vadd.f32 %v2179_v57, %v2144_v21  ;;  %v2124_v57 = vmul.f32 %v2060_v0, %v3568_v44  ;;  %v1999_v21 = vsel %vm1071_vm4, %v1998_v26, %v1994_v54  ;;  %v2064_v0 = vunpack.c.l.bf16 %v2584_v8 }
 0x428   :  { %v3602_v17 = vpop.permute.xlu0 %1823  ;;  %v2004_v58 = vsel %vm1078_vm5, %v2003_v24, %v1999_v21  ;;  %v2585_v24 = vld [vmem:[#allocation2 + $0x78] sm:$0xff]  }
 0x429   :  { %v2181_v34 = vadd.f32 %v2180_v37, %v2145_v12  ;;  %v2009_v12 = vsel %vm1085_vm6, %v2008_v2, %v2004_v58  ;;  %v2013_v37 = vrot.slane %v3576_v62, %v3158_v42  ;;  %v2127_v62 = vmul.f32 %v2063_v33, %v3582_v22  ;;  %v2586_v2 = vld [vmem:[#allocation2 + $0x20] sm:$0xff]  }
 0x42a   :  { %v2088_v26 = vunpack.c.l.bf16 %v2585_v24  ;;  %v2128_v47 = vmul.f32 %v2064_v0, %v3588_v13  ;;  %v1909_v33 = vrot.slane %v3568_v44, %v3112_v43  ;;  %v1914_v58 = vrot.slane %v3570_v27, %v3115_v15  ;;  %v2588_v27 = vld [vmem:[#allocation2 + $0x30] sm:$0xff]  }
 0x42b   :  { %v2182_v5 = vadd.f32 %v2181_v34, %v2146_v25  ;;  %v2155_v25 = vadd.f32 %v2154_v50, %v2124_v57  ;;  %v2014_v52 = vsel %vm1092_vm7, %v2013_v37, %v2009_v12  ;;  %v2065_v34 = vunpack.c.h.bf16 %v2584_v8 }
 0x42c   :  { %v3615_v18 = vpop.permute.xlu0 %1826  ;;  %v2019_v19 = vsel %vm1099_vm8, %v2018_v40, %v2014_v52  ;;  %v2089_v57 = vunpack.c.h.bf16 %v2585_v24  ;;  %v1919_v0 = vrot.slane %v3574_v23, %v3141_v46  ;;  %v1924_v15 = vrot.slane %v3582_v22, %v3137_v45 }
 0x42d   :  { %v2183_v32 = vadd.f32 %v2182_v5, %v2147_v20  ;;  %v2156_v28 = vadd.f32 %v2155_v25, %v2125_v35  ;;  %v3636_v20 = vpop.permute.xlu1 %1892  ;;  %v2066_v5 = vunpack.c.l.bf16 %v2586_v2  ;;  %v2129_v21 = vmul.f32 %v2065_v34, %v3602_v17 }
 0x42e   :  { %v2024_v35 = vsel %vm1106_vm9, %v2023_v55, %v2019_v19  ;;  %v2152_v37 = vmul.f32 %v2088_v26, %v3636_v20  ;;  %v2070_v25 = vunpack.c.l.bf16 %v2588_v27  ;;  %v1910_v52 = vsel %vm1057_vm2, %v1909_v33, %v3566_v6  ;;  %vm3879_vm2 = vmmov %vm3878_vm1 }
 0x42f   :  { %v2184_v61 = vadd.f32 %v2183_v32, %v2148_v48  ;;  %v2157_v36 = vadd.f32 %v2156_v28, %v2126_v7  ;;  %v2067_v32 = vunpack.c.h.bf16 %v2586_v2  ;;  %v2130_v8 = vmul.f32 %v2066_v5, %v3615_v18 }
 0x430   :  { %v3628_v38 = vpop.permute.xlu0 %1829  ;;  %v2029_v7 = vsel %vm3878_vm1, %v2028_v1, %v2024_v35  ;;  %v2033_v46 = vrot.slane %v3592_v39, %v3197_v31  ;;  %v1929_v23 = vrot.slane %v3588_v13, %v3149_v41  ;;  %v2071_v45 = vunpack.c.h.bf16 %v2588_v27 }
 0x431   :  { %v2185_v29 = vadd.f32 %v2184_v61, %v2149_v63  ;;  %v2158_v48 = vadd.f32 %v2157_v36, %v2127_v62  ;;  %v2587_v63 = vld [vmem:[#allocation2 + $0x28] sm:$0xff]   ;;  %v3657_v43 = vpop.permute.xlu1 %1895  ;;  %v2131_v3 = vmul.f32 %v2067_v32, %v3628_v38  ;;  %v1915_v22 = vsel %vm1064_vm3, %v1914_v58, %v1910_v52 }
 0x432   :  { %v2068_v12 = vunpack.c.l.bf16 %v2587_v63  ;;  %v2069_v44 = vunpack.c.h.bf16 %v2587_v63  ;;  %v2153_v40 = vmul.f32 %v2089_v57, %v3657_v43  ;;  %v2038_v6 = vrot.slane %v3599_v4, %v3216_v59 }
 0x433   :  { %v2186_v54 = vadd.f32 %v2185_v29, %v2150_v53  ;;  %v2159_v9 = vadd.f32 %v2158_v48, %v2128_v47  ;;  %v1934_v39 = vrot.slane %v3602_v17, %v3158_v42  ;;  %v2034_v24 = vsel %vm1120_vm11, %v2033_v46, %v2029_v7  ;;  %v2589_v47 = vld [vmem:[#allocation2 + $0x38] sm:$0xff]  }
 0x434   :  { %v3638_v56 = vpop.permute.xlu0 %1832  ;;  %v1939_v36 = vrot.slane %v3615_v18, %v3182_v10  ;;  %v2072_v19 = vunpack.c.l.bf16 %v2589_v47  ;;  %v1944_v4 = vrot.slane %v3628_v38, %v3178_v49  ;;  %v2039_v17 = vsel %vm1127_vm12, %v2038_v6, %v2034_v24 }
 0x435   :  { %v2187_v50 = vadd.f32 %v2186_v54, %v2151_v51  ;;  %v2160_v53 = vadd.f32 %v2159_v9, %v2129_v21  ;;  %v2132_v62 = vmul.f32 %v2068_v12, %v3638_v56  ;;  %v1920_v54 = vsel %vm1071_vm4, %v1919_v0, %v1915_v22 }
 0x436   :  { %v1925_v41 = vsel %vm1078_vm5, %v1924_v15, %v1920_v54  ;;  %v2043_v57 = vrot.slane %v3620_v16, %v3388_v30  ;;  %v1949_v21 = vrot.slane %v3638_v56, %v3190_v60  ;;  %v2073_v58 = vunpack.c.h.bf16 %v2589_v47 }
 0x437   :  { %v2188_v29 = vadd.f32 %v2187_v50, %v2152_v37  ;;  %v2161_v28 = vadd.f32 %v2160_v53, %v2130_v8  ;;  %v1930_v5 = vsel %vm1085_vm6, %v1929_v23, %v1925_v41  ;;  %v2048_v60 = vrot.slane %v3636_v20, %v3400_v14 }
 0x438   :  { %v1836_v61 = vpop.permute.xlu0 %1835  ;;  %v1935_v48 = vsel %vm1092_vm7, %v1934_v39, %v1930_v5  ;;  %v2044_v35 = vsel %vm1134_vm13, %v2043_v57, %v2039_v17  ;;  %v2053_v9 = vrot.slane %v3657_v43, %v3405_v11 }
 0x439   :  { %v2162_v13 = vadd.f32 %v2161_v28, %v2131_v3  ;;  %v2133_v26 = vmul.f32 %v2069_v44, %v1836_v61  ;;  %v2189_v2 = vadd.f32 %v2188_v29, %v2153_v40  ;;  %v1954_v10 = vrot.slane %v1836_v61, %v3197_v31 }
 0x43a   :  { %v1940_v33 = vsel %vm1099_vm8, %v1939_v36, %v1935_v48 }
 0x43b   :  { %v2163_v55 = vadd.f32 %v2162_v13, %v2132_v62  ;;  %v2190_v50 = vrot.slane %v2189_v2, 4  ;;  %v1945_v16 = vsel %vm1106_vm9, %v1944_v4, %v1940_v33 }
 0x43c   :  { %v1839_v34 = vpop.permute.xlu0 %1838  ;;  %v1950_v31 = vsel %vm3879_vm2, %v1949_v21, %v1945_v16 }
 0x43d   :  { %v2134_v42 = vmul.f32 %v2070_v25, %v1839_v34  ;;  %v2164_v18 = vadd.f32 %v2163_v55, %v2133_v26  ;;  %v1959_v49 = vrot.slane %v1839_v34, %v3216_v59  ;;  %v1955_v61 = vsel %vm1120_vm11, %v1954_v10, %v1950_v31 }
 0x43e   :  { %v2191_v37 = vadd.f32 %v2190_v50, %v2189_v2 }
 0x43f   :  { %v2165_v63 = vadd.f32 %v2164_v18, %v2134_v42  ;;  %v1960_v8 = vsel %vm1127_vm12, %v1959_v49, %v1955_v61 }
 0x440   :  { %v1842_v51 = vpop.permute.xlu0 %1841  ;;  %v2192_v53 = vrot.slane %v2191_v37, 2 }
 0x441   :  { %v2135_v32 = vmul.f32 %v2071_v45, %v1842_v51  ;;  %v1964_v12 = vrot.slane %v1842_v51, %v3388_v30  ;;  %v2049_v30 = vsel %vm1141_vm14, %v2048_v60, %v2044_v35 }
 0x442   :  { %v2054_v7 = vsel %vm1148_vm15, %v2053_v9, %v2049_v30 }
 0x443   :  { %v2166_v59 = vadd.f32 %v2165_v63, %v2135_v32  ;;  %v1965_v20 = vsel %vm1134_vm13, %v1964_v12, %v1960_v8 }
 0x444   :  { %v1845_v38 = vpop.permute.xlu0 %1844 }
 0x445   :  { %v2136_v1 = vmul.f32 %v2072_v19, %v1845_v38  ;;  %v1969_v56 = vrot.slane %v1845_v38, %v3400_v14 }
 0x447   :  { %v2167_v15 = vadd.f32 %v2166_v59, %v2136_v1  ;;  %v1970_v27 = vsel %vm1141_vm14, %v1969_v56, %v1965_v20 }
 0x448   :  { %v1848_v0 = vpop.permute.xlu0 %1847 }
 0x449   :  { %v1974_v44 = vrot.slane %v1848_v0, %v3405_v11  ;;  %v2137_v14 = vmul.f32 %v2073_v58, %v1848_v0 }
 0x44b   :  { %v2168_v25 = vadd.f32 %v2167_v15, %v2137_v14  ;;  %v1975_v43 = vsel %vm1148_vm15, %v1974_v44, %v1970_v27 }
 0x44c   :  { %v2055_v3 = vsel %vm1229_vm0, %v2054_v7, %v1975_v43 }
 0x44d   :  { %v2169_v29 = vrot.slane %v2168_v25, 4  ;;  %2057 = vst [vmem:[#allocation9] sm:$0x3] %v2055_v3 }
 0x44e   :  { %2667 = shalt.err (!%p2664_p0)
}
 0x44f   :  { %s2668_s22 = scalar_lea.hbm %s3764_s9, 32 }
 0x450   :  { %p2669_p1 = scmp.ne.s32.totalorder %s3764_s9, %s2668_s22  ;;  %p2672_p2 = scmp.lt.u32.totalorder %s2668_s22, %s3764_s9 }
 0x452   :  { %p2674_p3 = pnand %p2672_p2, %p2669_p1 }
 0x454   :  { %2677 = shalt.err (!%p2674_p3)
}
 0x455   :  { %2220 = dma.vmem_to_hbm [thread:$0]  %s2218_s18, 32, %s3764_s9, [#allocation10]   ;;  %v2170_v11 = vadd.f32 %v2169_v29, %v2168_v25  ;;  %v2193_v52 = vadd.f32 %v2192_v53, %v2191_v37 }
 0x456   :  { %s2678_s0 = scalar_lea.vmem %s3711_s14, 32  ;;  %p2683_p5 = scmp.lt.s32.totalorder %s3711_s14, %s3711_s14 }
 0x457   :  { %p2679_p4 = scmp.ne.s32.totalorder %s3711_s14, %s2678_s0  ;;  %p2684_p6 = scmp.lt.s32.totalorder %s2678_s0, %s2678_s0 }
 0x459   :  { %p2685_p7 = por %p2684_p6, %p2683_p5 }
 0x45b   :  { %p2686_p8 = pnand %p2685_p7, %p2679_p4 }
 0x45d   :  { %2689 = shalt.err (!%p2686_p8)
}
 0x45e   :  { %s2690_s25 = scalar_lea.hbm %s3765_s10, 32 }
 0x45f   :  { %p2691_p9 = scmp.ne.s32.totalorder %s3765_s10, %s2690_s25  ;;  %p2694_p10 = scmp.lt.u32.totalorder %s2690_s25, %s3765_s10 }
 0x461   :  { %p2696_p11 = pnand %p2694_p10, %p2691_p9 }
 0x463   :  { %2699 = shalt.err (!%p2696_p11)
}
 0x464   :  { %2230 = dma.vmem_to_hbm [thread:$0]  %s3711_s14, 32, %s3765_s10, [#allocation10]   ;;  %v2171_v46 = vrot.slane %v2170_v11, 2  ;;  %v2194_v34 = vrot.slane %v2193_v52, 1 }
 0x465   :  { %s2741_s13 = smov [#allocation8]  }
 0x466   :  { %v2172_v23 = vadd.f32 %v2171_v46, %v2170_v11  ;;  %s2207_s6 = sshll.u32 %s2741_s13, 4  ;;  %v2195_v40 = vadd.f32 %v2194_v34, %v2193_v52  ;;  %s2208_s6 = int_to_ptr.vmem [resolvable:$true] %s2207_s6 }
 0x467   :  { %s2700_s15 = scalar_lea.vmem %s2208_s6, 32  ;;  %p2705_p13 = scmp.lt.s32.totalorder %s2208_s6, %s2208_s6 }
 0x468   :  { %v2173_v45 = vrot.slane %v2172_v23, 1  ;;  %p2701_p12 = scmp.ne.s32.totalorder %s2208_s6, %s2700_s15  ;;  %p2706_p0 = scmp.lt.s32.totalorder %s2700_s15, %s2700_s15 }
 0x46a   :  { %v2174_v22 = vadd.f32 %v2173_v45, %v2172_v23  ;;  %p2707_p1 = por %p2706_p0, %p2705_p13 }
 0x46c   :  { %v2198_v28 = vsel %vm1229_vm0, %v2195_v40, %v2174_v22  ;;  %p2708_p2 = pnand %p2707_p1, %p2701_p12 }
 0x46d   :  { %2200 = vst [vmem:[#allocation8] sm:$0x3] %v2198_v28 }
 0x46e   :  { %2711 = shalt.err (!%p2708_p2)
}
 0x46f   :  { %s2712_s17 = scalar_lea.hbm %s3763_s8, 32 }
 0x470   :  { %p2713_p3 = scmp.ne.s32.totalorder %s3763_s8, %s2712_s17  ;;  %p2716_p4 = scmp.lt.u32.totalorder %s2712_s17, %s3763_s8 }
 0x472   :  { %p2718_p5 = pnand %p2716_p4, %p2713_p3 }
 0x474   :  { %2721 = shalt.err (!%p2718_p5)
}
 0x475   :  { %2210 = dma.vmem_to_hbm [thread:$0]  %s2208_s6, 32, %s3763_s8, [#allocation4]  }
 0x476   :  { %2726 = dma.done.wait [#allocation4], 32  }
 0x477   :  { %2727 = vsyncadd [#allocation4], 4294967264 }
 0x478   :  { %2728 = dma.done.wait [#allocation10], 64  }
 0x479   :  { %2729 = vsyncadd [#allocation10], 4294967232 }
 0x47a   :  { %2240 = vsyncpa [#allocation3], 1 }
 0x47b   :  { %2241 = vsyncpa [#allocation6], 1 }
 0x47c   :  { %2242 = vsyncpa [#allocation4], 1 }
 0x47d   :  { %2243 = vsyncpa [#allocation10], 1 }

</bundles_post_ra>
